<compile_context>
chip_gen: v7x
topology: tpu7x:2x2x1
jax: 0.10.0
libtpu: 0.0.40
codegen_flags: <defaults>
</compile_context>

<pallas_src>
import functools

import jax
import jax.numpy as jnp
import numpy as np
from jax.experimental import pallas as pl
from jax.experimental.pallas import tpu as pltpu


# --------------------------------------------------------------------------
# Kernels
# --------------------------------------------------------------------------

def _recon_gemm_kernel(x_ref, m_ref, out_ref):
    """Small-image path: whole update as one complex GEMM (Gauss 3-multiply).

    x_ref   : (2, TN, 2*HW)   rows = [diff | input];  [0]=real, [1]=imag
    m_ref   : (3, 2*HW, HWp)  [M_r, M_i, M_r+M_i]   (constant-side sum precomputed)
    out_ref : (2, TN, HWp)
    """
    xr = x_ref[0]
    xi = x_ref[1]
    p = jnp.dot(xr, m_ref[0], preferred_element_type=jnp.float32)
    q = jnp.dot(xi, m_ref[1], preferred_element_type=jnp.float32)
    s = jnp.dot(xr + xi, m_ref[2], preferred_element_type=jnp.float32)
    out_ref[0] = (p - q).astype(out_ref.dtype)
    out_ref[1] = (s - p - q).astype(out_ref.dtype)


def _recon_dft_kernel(x_ref, invd_ref, fh_ref, bdw_ref, out_ref):
    """Blocked path: fft2/ifft2 as DFT matmuls, slices packed along lanes.

    x_ref    : (4, H, TNW)    [diff_r, diff_i, in_r, in_i]
    invd_ref : (H, TNW)       1/((mask+rho)*H*W), tiled across the TN slices
    fh_ref   : (4, H, H)      [fh_r, fh_i, fh_r+fh_i, fh_r-fh_i]
    bdw_ref  : (6, TNW, TNW)  [rho*bw_r, rho*bw_i, rho*(bw_r+bw_i),
                               bw_r, bw_i, bw_r-bw_i]   (bw = blockdiag(F_W))
    out_ref  : (2, H, TNW)
    """
    dr = x_ref[0]
    di = x_ref[1]

    # forward DFT along H:  F_H @ D
    p = jnp.dot(fh_ref[0], dr, preferred_element_type=jnp.float32)
    q = jnp.dot(fh_ref[1], di, preferred_element_type=jnp.float32)
    s = jnp.dot(fh_ref[2], dr + di, preferred_element_type=jnp.float32)
    tr = p - q
    ti = s - p - q

    # forward DFT along W (rho folded into constants):  T @ blockdiag(rho*F_W)
    p = jnp.dot(tr, bdw_ref[0], preferred_element_type=jnp.float32)
    q = jnp.dot(ti, bdw_ref[1], preferred_element_type=jnp.float32)
    s = jnp.dot(tr + ti, bdw_ref[2], preferred_element_type=jnp.float32)
    yr = p - q
    yi = s - p - q

    # k-space update: (input + rho*fft2(diff)) * (1 / ((mask+rho)*H*W))
    invd = invd_ref[...]
    zr = (x_ref[2] + yr) * invd
    zi = (x_ref[3] + yi) * invd

    # inverse DFT along H:  conj(F_H) @ Z
    p = jnp.dot(fh_ref[0], zr, preferred_element_type=jnp.float32)
    q = jnp.dot(fh_ref[1], zi, preferred_element_type=jnp.float32)
    s = jnp.dot(fh_ref[3], zr + zi, preferred_element_type=jnp.float32)
    ur = p + q
    ui = s - p + q

    # inverse DFT along W:  U @ blockdiag(conj(F_W))   (1/(H*W) already in invd)
    p = jnp.dot(ur, bdw_ref[3], preferred_element_type=jnp.float32)
    q = jnp.dot(ui, bdw_ref[4], preferred_element_type=jnp.float32)
    s = jnp.dot(ur + ui, bdw_ref[5], preferred_element_type=jnp.float32)
    out_ref[0] = (p + q).astype(out_ref.dtype)
    out_ref[1] = (s - p + q).astype(out_ref.dtype)


# --------------------------------------------------------------------------
# Jitted wrappers (module-level so XLA/Mosaic compilation is cached across calls)
# --------------------------------------------------------------------------

@functools.partial(jax.jit, static_argnames=("tn", "vmem_limit"))
def _gemm_forward(minus, multi, inputt, m_slab, *, tn, vmem_limit):
    B, C, H, W = inputt.shape
    N = B * C
    hw = H * W
    k2 = m_slab.shape[1]          # 2*hw
    hwp = m_slab.shape[2]         # hw rounded up to a multiple of 128

    diff = (minus - multi).reshape(N, hw)
    inp = inputt.reshape(N, hw)
    xr = jnp.concatenate([jnp.real(diff), jnp.real(inp)], axis=1)
    xi = jnp.concatenate([jnp.imag(diff), jnp.imag(inp)], axis=1)
    x = jnp.stack([xr, xi]).astype(jnp.float32)                 # (2, N, 2*hw)

    n_pad = -(-N // tn) * tn
    if n_pad != N:
        x = jnp.pad(x, ((0, 0), (0, n_pad - N), (0, 0)))
    grid = n_pad // tn

    out = pl.pallas_call(
        _recon_gemm_kernel,
        out_shape=jax.ShapeDtypeStruct((2, n_pad, hwp), jnp.float32),
        grid_spec=pltpu.PrefetchScalarGridSpec(
            num_scalar_prefetch=0,
            grid=(grid,),
            in_specs=[
                pl.BlockSpec((2, tn, k2), lambda i: (0, i, 0)),
                # constant index_map -> pipeline fetches this slab only once
                pl.BlockSpec((3, k2, hwp), lambda i: (0, 0, 0)),
            ],
            out_specs=pl.BlockSpec((2, tn, hwp), lambda i: (0, i, 0)),
        ),
        compiler_params=pltpu.CompilerParams(
            dimension_semantics=("parallel",),
            vmem_limit_bytes=vmem_limit),
    )(x, m_slab)

    out_c = jax.lax.complex(out[0, :N, :hw], out[1, :N, :hw])
    return out_c.reshape(B, C, H, W)


@functools.partial(jax.jit, static_argnames=("tn", "vmem_limit"))
def _dft_forward(minus, multi, inputt, invd_t, fh_slab, bdw_slab, *, tn, vmem_limit):
    B, C, H, W = inputt.shape
    N = B * C
    tnw = invd_t.shape[1]
    wp = tnw // tn
    grid = N // tn

    def lanes(z):
        z = z.reshape(N, H, W)
        if wp != W:
            z = jnp.pad(z, ((0, 0), (0, 0), (0, wp - W)))
        return jnp.transpose(z, (1, 0, 2)).reshape(H, N * wp)

    d = lanes(minus - multi)
    t = lanes(inputt)
    # fused diff/input slab -> one streaming input per grid step
    x = jnp.stack([jnp.real(d), jnp.imag(d),
                   jnp.real(t), jnp.imag(t)]).astype(jnp.float32)   # (4, H, N*wp)

    out = pl.pallas_call(
        _recon_dft_kernel,
        out_shape=jax.ShapeDtypeStruct((2, H, N * wp), jnp.float32),
        grid_spec=pltpu.PrefetchScalarGridSpec(
            num_scalar_prefetch=0,
            grid=(grid,),
            in_specs=[
                pl.BlockSpec((4, H, tnw), lambda i: (0, 0, i)),
                # constant index_maps -> fetched once, kept resident in VMEM
                pl.BlockSpec((H, tnw), lambda i: (0, 0)),
                pl.BlockSpec((4, H, H), lambda i: (0, 0, 0)),
                pl.BlockSpec((6, tnw, tnw), lambda i: (0, 0, 0)),
            ],
            out_specs=pl.BlockSpec((2, H, tnw), lambda i: (0, 0, i)),
        ),
        compiler_params=pltpu.CompilerParams(
            dimension_semantics=("parallel",),
            vmem_limit_bytes=vmem_limit),
    )(x, invd_t, fh_slab, bdw_slab)

    out_c = jax.lax.complex(out[0], out[1])                     # (H, N*wp)
    out_c = out_c.reshape(H, N, wp).transpose(1, 0, 2)[:, :, :W]
    return out_c.reshape(B, C, H, W)


# --------------------------------------------------------------------------
# Host-side helpers
# --------------------------------------------------------------------------

def _dft_matrix(n):
    k = np.arange(n)
    return np.exp(-2j * np.pi * np.outer(k, k) / n)       # complex128, symmetric


def _block_diag(m, copies):
    n = m.shape[0]
    out = np.zeros((copies * n, copies * n), dtype=m.dtype)
    for c in range(copies):
        out[c * n:(c + 1) * n, c * n:(c + 1) * n] = m
    return out


def _vmem_capacity():
    try:
        return int(pltpu.get_tpu_info().vmem_capacity_bytes)
    except Exception:
        return 64 << 20            # conservative (v7x-sized) default


def _vmem_budget(stream_bytes, const_bytes, capacity):
    # explicit sum: double-buffered streaming blocks + (worst case) double-
    # buffered constants + 25% headroom, clamped below the physical VMEM.
    need = int((2 * stream_bytes + 2 * const_bytes) * 1.25) + (2 << 20)
    hi = min(max(24 << 20, int(capacity * 0.85)), 110 << 20)
    return min(max(need, 16 << 20), hi)


def _pick_rows_gemm(N):
    """Rows (slices) per grid step for the fused-GEMM path."""
    cands = [t for t in range(8, min(N, 256) + 1, 8)
             if N % t == 0 and N // t >= 2]
    if cands:
        return max(cands)
    return N if N <= 512 else 256


def _pick_tn_dft(N, H, W, capacity):
    """(slices per grid step, padded W) for the blocked DFT path."""
    spatial_cap = max(2 << 20, capacity // 10)   # one (4, H, TN*W) f32 block
    bd_cap = max(4 << 20, capacity // 5)         # (6, TNW, TNW) f32 constant slab

    def feasible(t):
        lanes = t * W
        if lanes % 128:
            return False
        if t > 1 and lanes > 256:    # >256 packed lanes only wastes MXU MACs
            return False
        if 4 * H * lanes * 4 > spatial_cap:
            return False
        if 6 * lanes * lanes * 4 > bd_cap:
            return False
        return True

    good = [t for t in range(1, N + 1) if N % t == 0 and feasible(t)]
    if good:
        # prefer enough grid steps that each TensorCore still pipelines
        min_grid = 4 if capacity <= (80 << 20) else 2
        for g in (min_grid, 2, 1):
            multi = [t for t in good if N // t >= g]
            if multi:
                return max(multi), W
    # no divisor is lane-dense: zero-pad W up to a multiple of 128, one slice/step
    return 1, (-(-W // 128) * 128)


# --------------------------------------------------------------------------
# Layer
# --------------------------------------------------------------------------

class ReconstructionUpdateLayer:
    """JAX/Pallas port of the CSNet reconstruction-update layer.

    `mask` is an (H, W) array, `rho` a python float.  Call with a dict holding
    'minus_output', 'multi_output', 'input' of shape (B, C, H, W) (complex);
    adds 're_mid_output' to the dict, exactly like the torch module.
    """

    def __init__(self, rho, mask):
        self.rho = float(rho)
        self.mask = np.asarray(mask, dtype=np.float64)
        H, W = self.mask.shape
        denom = self.mask + self.rho
        denom = np.where(denom == 0.0, 1e-6, denom)
        # loop-invariant: 1/(mask+rho) (with the ==0 -> 1e-6 substitution) and
        # the ifft2 1/(H*W) normalization, hoisted out of the kernels.
        self.inv_denom = (1.0 / denom) / float(H * W)
        self._cache = {}                          # cached device-side constants
        self._vmem_cap = _vmem_capacity()

    # ---- cached constant builders --------------------------------------
    def _gemm_constants(self, H, W, hwp):
        key = ("gemm", H, W)
        if key not in self._cache:
            hw = H * W
            fh = _dft_matrix(H)
            fw = _dft_matrix(W)
            g_fwd = np.kron(fh, fw)                        # vec(fft2), row-major vec
            g_inv = np.kron(np.conj(fh), np.conj(fw))      # vec(ifft2) * (H*W)
            b_op = g_inv * self.inv_denom.reshape(-1)[None, :]
            a_op = self.rho * (b_op @ g_fwd)
            m = np.concatenate([a_op.T, b_op.T], axis=0)   # (2*hw, hw) complex
            if hwp != hw:
                m = np.pad(m, ((0, 0), (0, hwp - hw)))
            m_slab = np.stack([m.real, m.imag, m.real + m.imag]).astype(np.float32)
            self._cache[key] = jnp.asarray(m_slab)
        return self._cache[key]

    def _dft_constants(self, H, W, tn, wp):
        key = ("dft", H, W, tn, wp)
        if key not in self._cache:
            fh = _dft_matrix(H)
            fh_slab = np.stack([fh.real, fh.imag,
                                fh.real + fh.imag,
                                fh.real - fh.imag]).astype(np.float32)
            fw = np.zeros((wp, wp), dtype=np.complex128)
            fw[:W, :W] = _dft_matrix(W)
            bw_r = _block_diag(fw.real, tn)
            bw_i = _block_diag(fw.imag, tn)
            bdw_slab = np.stack([self.rho * bw_r, self.rho * bw_i,
                                 self.rho * (bw_r + bw_i),
                                 bw_r, bw_i, bw_r - bw_i]).astype(np.float32)
            invd = np.pad(self.inv_denom, ((0, 0), (0, wp - W)), constant_values=1.0)
            invd_t = np.tile(invd, (1, tn)).astype(np.float32)
            self._cache[key] = (jnp.asarray(invd_t), jnp.asarray(fh_slab),
                                jnp.asarray(bdw_slab))
        return self._cache[key]

    # ---- forward --------------------------------------------------------
    def __call__(self, x):
        minus = jnp.asarray(x['minus_output'], dtype=jnp.complex64)
        multi = jnp.asarray(x['multi_output'], dtype=jnp.complex64)
        inputt = jnp.asarray(x['input'], dtype=jnp.complex64)

        B, C, H, W = inputt.shape
        N = B * C
        hw = H * W
        hwp = -(-hw // 128) * 128
        cap = self._vmem_cap

        m_bytes = 3 * (2 * hw) * hwp * 4
        if m_bytes <= min(cap // 6, 16 << 20):
            # small image: whole update as one precomputed complex GEMM
            m_slab = self._gemm_constants(H, W, hwp)
            tn = _pick_rows_gemm(N)
            stream = (2 * tn * 2 * hw + 2 * tn * hwp) * 4
            out = _gemm_forward(minus, multi, inputt, m_slab, tn=tn,
                                vmem_limit=_vmem_budget(stream, m_bytes, cap))
        else:
            # larger image: blocked 4-stage DFT-matmul kernel
            tn, wp = _pick_tn_dft(N, H, W, cap)
            invd_t, fh_slab, bdw_slab = self._dft_constants(H, W, tn, wp)
            tnw = tn * wp
            stream = (4 * H * tnw + 2 * H * tnw) * 4
            const = (H * tnw + 4 * H * H + 6 * tnw * tnw) * 4
            out = _dft_forward(minus, multi, inputt, invd_t, fh_slab, bdw_slab,
                               tn=tn, vmem_limit=_vmem_budget(stream, const, cap))

        x['re_mid_output'] = out
        return x


# --------------------------------------------------------------------------
# Demo / self-test
# --------------------------------------------------------------------------

if __name__ == "__main__":
    rho = 0.5

    def make_case(key, B, C, H, W):
        ks = jax.random.split(key, 7)

        def cplx(kr, ki):
            return (jax.random.normal(kr, (B, C, H, W), jnp.float32)
                    + 1j * jax.random.normal(ki, (B, C, H, W), jnp.float32)
                    ).astype(jnp.complex64)

        minus = cplx(ks[0], ks[1])
        multi = cplx(ks[2], ks[3])
        inputt = cplx(ks[4], ks[5])
        mask = jax.random.bernoulli(ks[6], 0.4, (H, W)).astype(jnp.float32)
        return minus, multi, inputt, mask

    def reference(minus, multi, inputt, mask, rho):
        number = inputt + rho * jnp.fft.fft2(minus - multi)
        denom = mask + rho
        denom = jnp.where(denom == 0, jnp.float32(1e-6), denom)
        return jnp.fft.ifft2(number / denom)

    key = jax.random.PRNGKey(0)
    k1, k2 = jax.random.split(key)

    # ---- small-image case (2,4,16,16): fused single-GEMM path ----
    minus, multi, inputt, mask = make_case(k1, 2, 4, 16, 16)
    layer = ReconstructionUpdateLayer(rho, mask)
    out = layer({'minus_output': minus, 'multi_output': multi, 'input': inputt}
                )['re_mid_output']
    out = jax.block_until_ready(out)
    ref = reference(minus, multi, inputt, mask, rho)
    np.testing.assert_allclose(np.real(out), np.real(ref), atol=5e-4, rtol=5e-4)
    np.testing.assert_allclose(np.imag(out), np.imag(ref), atol=5e-4, rtol=5e-4)

    # second call exercises the constant / compilation caches
    out2 = jax.block_until_ready(
        layer({'minus_output': minus, 'multi_output': multi, 'input': inputt}
              )['re_mid_output'])
    np.testing.assert_allclose(np.asarray(out2), np.asarray(out),
                               atol=1e-6, rtol=1e-6)

    # ---- larger-image case (2,4,64,64): blocked DFT-matmul path ----
    minus, multi, inputt, mask = make_case(k2, 2, 4, 64, 64)
    layer2 = ReconstructionUpdateLayer(rho, mask)
    out = jax.block_until_ready(
        layer2({'minus_output': minus, 'multi_output': multi, 'input': inputt}
               )['re_mid_output'])
    ref = reference(minus, multi, inputt, mask, rho)
    np.testing.assert_allclose(np.real(out), np.real(ref), atol=5e-4, rtol=5e-4)
    np.testing.assert_allclose(np.imag(out), np.imag(ref), atol=5e-4, rtol=5e-4)

    print("KERNEL_OK")
</pallas_src>

<mosaic_0001>
module attributes {stable_mosaic.version = 11 : i64} {
  func.func @_recon_gemm_kernel(%arg0: i32, %arg1: memref<2x8x512xf32, #tpu.memory_space<vmem>>, %arg2: memref<3x512x256xf32, #tpu.memory_space<vmem>>, %arg3: memref<2x8x256xf32, #tpu.memory_space<vmem>>) attributes {dimension_semantics = [#tpu.dimension_semantics<parallel>], iteration_bounds = array<i64: 1>, scalar_prefetch = 0 : i64, scratch_operands = 0 : i64, tpu.core_type = #tpu.core_type<tc>, window_params = [{transform_indices = @transform_0, window_bounds = array<i64: 2, 8, 512>}, {pipeline_mode = #tpu.pipeline_mode<synchronous>, transform_indices = @transform_1, window_bounds = array<i64: 3, 512, 256>}, {transform_indices = @transform_2, window_bounds = array<i64: 2, 8, 256>}]} {
    %c0 = arith.constant 0 : index
    %c0_0 = arith.constant 0 : index
    %c0_1 = arith.constant 0 : index
    %0 = vector.load %arg1[%c0, %c0_0, %c0_1] : memref<2x8x512xf32, #tpu.memory_space<vmem>>, vector<1x8x512xf32>
    %1 = vector.shape_cast %0 : vector<1x8x512xf32> to vector<8x512xf32>
    %c1 = arith.constant 1 : index
    %c0_2 = arith.constant 0 : index
    %c0_3 = arith.constant 0 : index
    %2 = vector.load %arg1[%c1, %c0_2, %c0_3] : memref<2x8x512xf32, #tpu.memory_space<vmem>>, vector<1x8x512xf32>
    %3 = vector.shape_cast %2 : vector<1x8x512xf32> to vector<8x512xf32>
    %c0_4 = arith.constant 0 : index
    %c0_5 = arith.constant 0 : index
    %c0_6 = arith.constant 0 : index
    %4 = vector.load %arg2[%c0_4, %c0_5, %c0_6] : memref<3x512x256xf32, #tpu.memory_space<vmem>>, vector<1x512x256xf32>
    %5 = vector.shape_cast %4 : vector<1x512x256xf32> to vector<512x256xf32>
    %cst = arith.constant dense<0.000000e+00> : vector<8x256xf32>
    %6 = tpu.matmul %1, %5, %cst {dimension_numbers = #tpu.dot_dimension_numbers<[1], [0], [0], [1], [0, 0, 1, 1], [], []>} : vector<8x512xf32>, vector<512x256xf32>, vector<8x256xf32> -> vector<8x256xf32>
    %c1_7 = arith.constant 1 : index
    %c0_8 = arith.constant 0 : index
    %c0_9 = arith.constant 0 : index
    %7 = vector.load %arg2[%c1_7, %c0_8, %c0_9] : memref<3x512x256xf32, #tpu.memory_space<vmem>>, vector<1x512x256xf32>
    %8 = vector.shape_cast %7 : vector<1x512x256xf32> to vector<512x256xf32>
    %cst_10 = arith.constant dense<0.000000e+00> : vector<8x256xf32>
    %9 = tpu.matmul %3, %8, %cst_10 {dimension_numbers = #tpu.dot_dimension_numbers<[1], [0], [0], [1], [0, 0, 1, 1], [], []>} : vector<8x512xf32>, vector<512x256xf32>, vector<8x256xf32> -> vector<8x256xf32>
    %10 = arith.addf %1, %3 : vector<8x512xf32>
    %c2 = arith.constant 2 : index
    %c0_11 = arith.constant 0 : index
    %c0_12 = arith.constant 0 : index
    %11 = vector.load %arg2[%c2, %c0_11, %c0_12] : memref<3x512x256xf32, #tpu.memory_space<vmem>>, vector<1x512x256xf32>
    %12 = vector.shape_cast %11 : vector<1x512x256xf32> to vector<512x256xf32>
    %cst_13 = arith.constant dense<0.000000e+00> : vector<8x256xf32>
    %13 = tpu.matmul %10, %12, %cst_13 {dimension_numbers = #tpu.dot_dimension_numbers<[1], [0], [0], [1], [0, 0, 1, 1], [], []>} : vector<8x512xf32>, vector<512x256xf32>, vector<8x256xf32> -> vector<8x256xf32>
    %14 = arith.subf %6, %9 : vector<8x256xf32>
    %c0_14 = arith.constant 0 : index
    %c0_15 = arith.constant 0 : index
    %c0_16 = arith.constant 0 : index
    %15 = vector.load %arg3[%c0_14, %c0_15, %c0_16] : memref<2x8x256xf32, #tpu.memory_space<vmem>>, vector<1x8x256xf32>
    %16 = vector.shape_cast %15 : vector<1x8x256xf32> to vector<8x256xf32>
    %17 = vector.shape_cast %14 : vector<8x256xf32> to vector<1x8x256xf32>
    tpu.vector_store %arg3[%c0_14, %c0_15, %c0_16], %17 {strides = array<i32>} : memref<2x8x256xf32, #tpu.memory_space<vmem>>, vector<1x8x256xf32>,
    %18 = arith.subf %13, %6 : vector<8x256xf32>
    %19 = arith.subf %18, %9 : vector<8x256xf32>
    %c1_17 = arith.constant 1 : index
    %c0_18 = arith.constant 0 : index
    %c0_19 = arith.constant 0 : index
    %20 = vector.load %arg3[%c1_17, %c0_18, %c0_19] : memref<2x8x256xf32, #tpu.memory_space<vmem>>, vector<1x8x256xf32>
    %21 = vector.shape_cast %20 : vector<1x8x256xf32> to vector<8x256xf32>
    %22 = vector.shape_cast %19 : vector<8x256xf32> to vector<1x8x256xf32>
    tpu.vector_store %arg3[%c1_17, %c0_18, %c0_19], %22 {strides = array<i32>} : memref<2x8x256xf32, #tpu.memory_space<vmem>>, vector<1x8x256xf32>,
    return
  }
  func.func @transform_0(%arg0: i32) -> (i32, i32, i32) {
    %c0_i32 = arith.constant 0 : i32
    %c0_i32_0 = arith.constant 0 : i32
    %c0_i32_1 = arith.constant 0 : i32
    return %c0_i32, %arg0, %c0_i32_0 : i32, i32, i32
  }
  func.func @transform_1(%arg0: i32) -> (i32, i32, i32) {
    %c0_i32 = arith.constant 0 : i32
    %c0_i32_0 = arith.constant 0 : i32
    %c0_i32_1 = arith.constant 0 : i32
    %c0_i32_2 = arith.constant 0 : i32
    return %c0_i32, %c0_i32_0, %c0_i32_1 : i32, i32, i32
  }
  func.func @transform_2(%arg0: i32) -> (i32, i32, i32) {
    %c0_i32 = arith.constant 0 : i32
    %c0_i32_0 = arith.constant 0 : i32
    %c0_i32_1 = arith.constant 0 : i32
    return %c0_i32, %arg0, %c0_i32_0 : i32, i32, i32
  }
}

</mosaic_0001>

<bundles_post_ra>
// kernel: custom-call
= control target key start
LH: loop header
LB: loop body
LE: loop exit
PB: predicated region body
PF: predicated region fallthrough
CT: control target
= control target key end

     0   :  { %2 = vsyncpa [#allocation0], 0  ;;  %s61_s0 = inlined_call_operand.hbm [shape: c64[2,4,16,16], index: 0, kind: input, shape index: {}]   ;;  %s62_s1 = inlined_call_operand.vmem [shape: f32[2,4,16,16], index: 1, kind: output, shape index: {}]  }
   0x1   :  { %s3_s8 = sshll.u32 %s62_s1, 4  ;;  %s9_s11 = scalar_lea.hbm %s61_s0, 2048  ;;  %s4_s8 = int_to_ptr.vmem [resolvable:$true] %s3_s8 }
   0x2   :  { %p10_p0 = scmp.ne.s32.totalorder %s61_s0, %s9_s11  ;;  %s11_s16 = scalar_lea.hbm %s61_s0, 4096 }
   0x3   :  { %p12_p1 = scmp.lt.u32.totalorder %s11_s16, %s9_s11  ;;  %p13_p2 = scmp.lt.u32.totalorder %s9_s11, %s61_s0 }
   0x5   :  { %p14_p3 = por %p13_p2, %p12_p1 }
   0x7   :  { %p15_p4 = pnand %p14_p3, %p10_p0 }
   0x9   :  { %18 = shalt.err (!%p15_p4)  }
   0xa   :  { %s19_s1 = scalar_lea.vmem %s4_s8, 2048  ;;  %p24_p6 = scmp.lt.s32.totalorder %s4_s8, %s4_s8 }
   0xb   :  { %p20_p5 = scmp.ne.s32.totalorder %s4_s8, %s19_s1  ;;  %p25_p7 = scmp.lt.s32.totalorder %s19_s1, %s19_s1 }
   0xd   :  { %p26_p8 = por %p25_p7, %p24_p6 }
   0xf   :  { %p27_p9 = pnand %p26_p8, %p20_p5 }
  0x11   :  { %30 = shalt.err (!%p27_p9)  }
  0x12   :  { %6 = dma.hbm_to_vmem [thread:$0]  %s61_s0, 2048, %s4_s8, [#allocation0] }
  0x13   :  { %31 = dma.done.wait [#allocation0], 2048  }
  0x14   :  { %32 = vsyncadd [#allocation0], 4294965248 }
  0x15   :  { %8 = vsyncpa [#allocation0], 1 }

// kernel: custom-call.1
= control target key start
LH: loop header
LB: loop body
LE: loop exit
PB: predicated region body
PF: predicated region fallthrough
CT: control target
= control target key end

     0   :  { %s59_s0 = inlined_call_operand.hbm [shape: c64[2,4,16,16], index: 0, kind: input, shape index: {}]   ;;  %s60_s1 = inlined_call_operand.vmem [shape: f32[2,4,16,16], index: 1, kind: output, shape index: {}]  }
   0x1   :  { %s2_s8 = scalar_lea.hbm %s59_s0, 2048 }
   0x2   :  { %3 = vsyncpa [#allocation0], 0  ;;  %s4_s11 = sshll.u32 %s60_s1, 4  ;;  %s34_s14 = scalar_lea.hbm %s59_s0, 4096  ;;  %s5_s11 = int_to_ptr.vmem [resolvable:$true] %s4_s11 }
   0x3   :  { %p11_p0 = scmp.ne.s32.totalorder %s2_s8, %s34_s14  ;;  %p13_p1 = scmp.lt.u32.totalorder %s2_s8, %s59_s0 }
   0x4   :  { %p14_p2 = scmp.lt.u32.totalorder %s34_s14, %s34_s14  ;;  %p16_p4 = scmp.lt.u32.totalorder %s34_s14, %s2_s8 }
   0x6   :  { %p15_p3 = por %p14_p2, %p13_p1 }
   0x8   :  { %p17_p5 = por %p16_p4, %p15_p3 }
   0xa   :  { %p18_p6 = pnand %p17_p5, %p11_p0 }
   0xc   :  { %21 = shalt.err (!%p18_p6)  }
   0xd   :  { %s22_s17 = scalar_lea.vmem %s5_s11, 2048  ;;  %p27_p8 = scmp.lt.s32.totalorder %s5_s11, %s5_s11 }
   0xe   :  { %p23_p7 = scmp.ne.s32.totalorder %s5_s11, %s22_s17  ;;  %p28_p9 = scmp.lt.s32.totalorder %s22_s17, %s22_s17 }
  0x10   :  { %p29_p10 = por %p28_p9, %p27_p8 }
  0x12   :  { %p30_p11 = pnand %p29_p10, %p23_p7 }
  0x14   :  { %33 = shalt.err (!%p30_p11)  }
  0x15   :  { %7 = dma.hbm_to_vmem [thread:$0]  %s2_s8, 2048, %s5_s11, [#allocation0] }
  0x16   :  { %35 = dma.done.wait [#allocation0], 2048  }
  0x17   :  { %36 = vsyncadd [#allocation0], 4294965248 }
  0x18   :  { %9 = vsyncpa [#allocation0], 1 }

// kernel: custom-call.6
= control target key start
LH: loop header
LB: loop body
LE: loop exit
PB: predicated region body
PF: predicated region fallthrough
CT: control target
= control target key end

     0   :  { %s126_s0 = inlined_call_operand.vmem [shape: f32[2,4,16,16], index: 0, kind: input, shape index: {}]   ;;  %s127_s1 = inlined_call_operand.vmem [shape: f32[2,4,16,16], index: 1, kind: input, shape index: {}]   ;;  %s128_s2 = inlined_call_operand.hbm [shape: c64[2,4,16,16], index: 2, kind: output, shape index: {}]  }
   0x1   :  { %s87_s11 = scalar_lea.hbm %s128_s2, 2048 }
   0x2   :  { %4 = vsyncpa [#allocation0], 0  ;;  %s5_s14 = sshll.u32 %s126_s0, 4  ;;  %s6_s14 = int_to_ptr.vmem [resolvable:$true] %s5_s14 }
   0x3   :  { %s18_s15 = scalar_lea.vmem %s6_s14, 2048  ;;  %p23_p1 = scmp.lt.s32.totalorder %s6_s14, %s6_s14 }
   0x4   :  { %p19_p0 = scmp.ne.s32.totalorder %s6_s14, %s18_s15  ;;  %p24_p2 = scmp.lt.s32.totalorder %s18_s15, %s18_s15 }
   0x6   :  { %p25_p3 = por %p24_p2, %p23_p1 }
   0x8   :  { %p26_p4 = pnand %p25_p3, %p19_p0 }
   0xa   :  { %29 = shalt.err (!%p26_p4)  }
   0xb   :  { %p31_p5 = scmp.ne.s32.totalorder %s128_s2, %s87_s11  ;;  %s32_s0 = scalar_lea.hbm %s128_s2, 4096 }
   0xc   :  { %p33_p6 = scmp.lt.u32.totalorder %s32_s0, %s87_s11  ;;  %p34_p7 = scmp.lt.u32.totalorder %s87_s11, %s128_s2 }
   0xe   :  { %p35_p8 = por %p34_p7, %p33_p6 }
  0x10   :  { %p36_p9 = pnand %p35_p8, %p31_p5 }
  0x12   :  { %39 = shalt.err (!%p36_p9)  }
  0x13   :  { %8 = dma.vmem_to_hbm [thread:$0]  %s6_s14, 2048, %s128_s2, [#allocation0] }
  0x14   :  { %65 = dma.done.wait [#allocation0], 2048  }
  0x15   :  { %66 = vsyncadd [#allocation0], 4294965248 }
  0x16   :  { %10 = vsyncpa [#allocation0], 1 }
  0x17   :  { %11 = vsyncpa [#allocation1], 0  ;;  %s12_s28 = sshll.u32 %s127_s1, 4  ;;  %s13_s28 = int_to_ptr.vmem [resolvable:$true] %s12_s28 }
  0x18   :  { %s40_s29 = scalar_lea.vmem %s13_s28, 2048  ;;  %p45_p11 = scmp.lt.s32.totalorder %s13_s28, %s13_s28 }
  0x19   :  { %p41_p10 = scmp.ne.s32.totalorder %s13_s28, %s40_s29  ;;  %p46_p12 = scmp.lt.s32.totalorder %s40_s29, %s40_s29 }
  0x1b   :  { %p47_p13 = por %p46_p12, %p45_p11 }
  0x1d   :  { %p48_p0 = pnand %p47_p13, %p41_p10 }
  0x1f   :  { %51 = shalt.err (!%p48_p0)  }
  0x20   :  { %p53_p1 = scmp.ne.s32.totalorder %s87_s11, %s32_s0  ;;  %p56_p2 = scmp.lt.u32.totalorder %s32_s0, %s32_s0 }
  0x22   :  { %p57_p3 = por %p56_p2, %p34_p7 }
  0x24   :  { %p59_p4 = por %p57_p3, %p33_p6 }
  0x26   :  { %p60_p5 = pnand %p59_p4, %p53_p1 }
  0x28   :  { %63 = shalt.err (!%p60_p5)  }
  0x29   :  { %15 = dma.vmem_to_hbm [thread:$0]  %s13_s28, 2048, %s87_s11, [#allocation1] }
  0x2a   :  { %67 = dma.done.wait [#allocation1], 2048  }
  0x2b   :  { %68 = vsyncadd [#allocation1], 4294965248 }
  0x2c   :  { %17 = vsyncpa [#allocation1], 1 }

// kernel: _gemm_forward.1
= control target key start
LH: loop header
LB: loop body
LE: loop exit
PB: predicated region body
PF: predicated region fallthrough
CT: control target
= control target key end

     0   :  { %7 = vsyncpa [#allocation3], 0  ;;  %s1290_s9 = smov [#allocation2]   ;;  %s1371_s0 = inlined_call_operand.vmem [shape: f32[2,8,512], index: 0, kind: input, shape index: {}]   ;;  %s1372_s1 = inlined_call_operand.hbm [shape: f32[3,512,256], index: 1, kind: input, shape index: {}]   ;;  %s1373_s2 = inlined_call_operand.vmem [shape: f32[2,8,256], index: 2, kind: output, shape index: {}]  }
   0x1   :  { %s15_s10 = sshll.u32 %s1290_s9, 4  ;;  %s1266_s13 = scalar_lea.hbm %s1372_s1, 49152  ;;  %s16_s10 = int_to_ptr.vmem [resolvable:$true] %s15_s10 }
   0x2   :  { %p1267_p0 = scmp.ne.s32.totalorder %s1372_s1, %s1266_s13  ;;  %p1270_p1 = scmp.lt.u32.totalorder %s1266_s13, %s1372_s1 }
   0x4   :  { %p1272_p2 = pnand %p1270_p1, %p1267_p0 }
   0x6   :  { %1275 = shalt.err (!%p1272_p2)
}
   0x7   :  { %s1276_s18 = scalar_lea.vmem %s16_s10, 49152  ;;  %p1281_p4 = scmp.lt.s32.totalorder %s16_s10, %s16_s10 }
   0x8   :  { %p1277_p3 = scmp.ne.s32.totalorder %s16_s10, %s1276_s18  ;;  %p1282_p5 = scmp.lt.s32.totalorder %s1276_s18, %s1276_s18 }
   0xa   :  { %p1283_p6 = por %p1282_p5, %p1281_p4 }
   0xc   :  { %p1284_p7 = pnand %p1283_p6, %p1277_p3 }
   0xe   :  { %1287 = shalt.err (!%p1284_p7)
}
   0xf   :  { %s1291_s19 = smov 256   ;;  %s1292_s20 = smov 16  }
  0x10   :  { %21 = dma.hbm_to_vmem [thread:$0]  %s1372_s1, 49152, %s16_s10, [#allocation3], %s1291_s19, %s1291_s19, %s1292_s20  }
  0x11   :  { %1288 = dma.done.wait [#allocation3], 49152  }
  0x12   :  { %1289 = vsyncadd [#allocation3], 4294918144  ;;  %v35_v0 = vld [vmem:[#allocation2 + $0x8] sm:$0xff]  ;;  %v37_v1 = vld [vmem:[#allocation2 + $0x18] sm:$0xff] }
  0x13   :  { %v99_v2 = vld [vmem:[#allocation2 + $0x208] sm:$0xff]  ;;  %v872_v3 = vpack.c.bf16 %v37_v1, %v35_v0  ;;  %v101_v4 = vld [vmem:[#allocation2 + $0x218] sm:$0xff]  ;;  %v34_v5 = vld [vmem:[#allocation2] sm:$0xff] }
  0x14   :  { %v36_v6 = vld [vmem:[#allocation2 + $0x10] sm:$0xff]  ;;  %v936_v7 = vpack.c.bf16 %v101_v4, %v99_v2  ;;  %v98_v9 = vld [vmem:[#allocation2 + $0x200] sm:$0xff]  ;;  %v39_v11 = vld [vmem:[#allocation2 + $0x28] sm:$0xff] }
  0x15   :  { %v874_v8 = vpack.c.bf16 %v36_v6, %v34_v5  ;;  %v100_v10 = vld [vmem:[#allocation2 + $0x210] sm:$0xff]  ;;  %873 = vmatprep.subr.bf16.mxu1 %v872_v3  ;;  %v41_v13 = vld [vmem:[#allocation2 + $0x38] sm:$0xff]  ;;  %v103_v14 = vld [vmem:[#allocation2 + $0x228] sm:$0xff] }
  0x16   :  { %v938_v12 = vpack.c.bf16 %v100_v10, %v98_v9  ;;  %v105_v15 = vld [vmem:[#allocation2 + $0x238] sm:$0xff]  ;;  %937 = vmatprep.subr.bf16.mxu0 %v936_v7  ;;  %v876_v16 = vpack.c.bf16 %v41_v13, %v39_v11  ;;  %v38_v18 = vld [vmem:[#allocation2 + $0x20] sm:$0xff]  ;;  %v40_v19 = vld [vmem:[#allocation2 + $0x30] sm:$0xff] }
  0x17   :  { %875 = vmatpush1.bf16.msra.mxu1 %v874_v8  ;;  %v940_v17 = vpack.c.bf16 %v105_v15, %v103_v14  ;;  %v102_v20 = vld [vmem:[#allocation2 + $0x220] sm:$0xff]  ;;  %v878_v21 = vpack.c.bf16 %v40_v19, %v38_v18  ;;  %v104_v22 = vld [vmem:[#allocation2 + $0x230] sm:$0xff]  ;;  %v43_v23 = vld [vmem:[#allocation2 + $0x48] sm:$0xff] }
  0x18   :  { %939 = vmatpush1.bf16.msra.mxu0 %v938_v12  ;;  %v45_v24 = vld [vmem:[#allocation2 + $0x58] sm:$0xff]  ;;  %877 = vmatprep.subr.bf16.mxu1 %v876_v16  ;;  %v942_v25 = vpack.c.bf16 %v104_v22, %v102_v20  ;;  %v107_v27 = vld [vmem:[#allocation2 + $0x248] sm:$0xff]  ;;  %v42_v29 = vld [vmem:[#allocation2 + $0x40] sm:$0xff] }
  0x19   :  { %941 = vmatprep.subr.bf16.mxu0 %v940_v17  ;;  %v880_v26 = vpack.c.bf16 %v45_v24, %v43_v23  ;;  %v109_v28 = vld [vmem:[#allocation2 + $0x258] sm:$0xff]  ;;  %v44_v31 = vld [vmem:[#allocation2 + $0x50] sm:$0xff]  ;;  %v106_v32 = vld [vmem:[#allocation2 + $0x240] sm:$0xff] }
  0x1a   :  { %v944_v30 = vpack.c.bf16 %v109_v28, %v107_v27  ;;  %v108_v33 = vld [vmem:[#allocation2 + $0x250] sm:$0xff]  ;;  %v882_v34 = vpack.c.bf16 %v44_v31, %v42_v29  ;;  %v47_v35 = vld [vmem:[#allocation2 + $0x68] sm:$0xff]  ;;  %v49_v36 = vld [vmem:[#allocation2 + $0x78] sm:$0xff] }
  0x1b   :  { %879 = vmatpush1.bf16.msra.mxu1 %v878_v21  ;;  %v111_v37 = vld [vmem:[#allocation2 + $0x268] sm:$0xff]  ;;  %v946_v38 = vpack.c.bf16 %v108_v33, %v106_v32  ;;  %v884_v39 = vpack.c.bf16 %v49_v36, %v47_v35  ;;  %v113_v40 = vld [vmem:[#allocation2 + $0x278] sm:$0xff]  ;;  %v46_v41 = vld [vmem:[#allocation2 + $0x60] sm:$0xff] }
  0x1c   :  { %943 = vmatpush1.bf16.msra.mxu0 %v942_v25  ;;  %881 = vmatprep.subr.bf16.mxu1 %v880_v26  ;;  %v48_v42 = vld [vmem:[#allocation2 + $0x70] sm:$0xff]  ;;  %v948_v43 = vpack.c.bf16 %v113_v40, %v111_v37  ;;  %v110_v44 = vld [vmem:[#allocation2 + $0x260] sm:$0xff]  ;;  %v51_v46 = vld [vmem:[#allocation2 + $0x88] sm:$0xff] }
  0x1d   :  { %945 = vmatprep.subr.bf16.mxu0 %v944_v30  ;;  %v112_v45 = vld [vmem:[#allocation2 + $0x270] sm:$0xff]  ;;  %v53_v47 = vld [vmem:[#allocation2 + $0x98] sm:$0xff]  ;;  %v115_v48 = vld [vmem:[#allocation2 + $0x288] sm:$0xff]  ;;  %v886_v50 = vpack.c.bf16 %v48_v42, %v46_v41 }
  0x1e   :  { %v117_v49 = vld [vmem:[#allocation2 + $0x298] sm:$0xff]  ;;  %v950_v51 = vpack.c.bf16 %v112_v45, %v110_v44  ;;  %v888_v52 = vpack.c.bf16 %v53_v47, %v51_v46  ;;  %v50_v53 = vld [vmem:[#allocation2 + $0x80] sm:$0xff]  ;;  %v52_v54 = vld [vmem:[#allocation2 + $0x90] sm:$0xff] }
  0x1f   :  { %883 = vmatpush1.bf16.msra.mxu1 %v882_v34  ;;  %v114_v55 = vld [vmem:[#allocation2 + $0x280] sm:$0xff]  ;;  %v952_v56 = vpack.c.bf16 %v117_v49, %v115_v48  ;;  %v116_v57 = vld [vmem:[#allocation2 + $0x290] sm:$0xff]  ;;  %v55_v58 = vld [vmem:[#allocation2 + $0xa8] sm:$0xff]  ;;  %v890_v62 = vpack.c.bf16 %v52_v54, %v50_v53 }
  0x20   :  { %947 = vmatpush1.bf16.msra.mxu0 %v946_v38  ;;  %885 = vmatprep.subr.bf16.mxu1 %v884_v39  ;;  %v57_v59 = vld [vmem:[#allocation2 + $0xb8] sm:$0xff]  ;;  %v119_v60 = vld [vmem:[#allocation2 + $0x2a8] sm:$0xff]  ;;  %v954_v63 = vpack.c.bf16 %v116_v57, %v114_v55  ;;  %v54_v1 = vld [vmem:[#allocation2 + $0xa0] sm:$0xff] }
  0x21   :  { %949 = vmatprep.subr.bf16.mxu0 %v948_v43  ;;  %v121_v61 = vld [vmem:[#allocation2 + $0x2b8] sm:$0xff]  ;;  %v892_v0 = vpack.c.bf16 %v57_v59, %v55_v58  ;;  %v56_v2 = vld [vmem:[#allocation2 + $0xb0] sm:$0xff]  ;;  %v118_v3 = vld [vmem:[#allocation2 + $0x2a0] sm:$0xff] }
  0x22   :  { %v956_v4 = vpack.c.bf16 %v121_v61, %v119_v60  ;;  %v120_v5 = vld [vmem:[#allocation2 + $0x2b0] sm:$0xff]  ;;  %v59_v6 = vld [vmem:[#allocation2 + $0xc8] sm:$0xff]  ;;  %v61_v7 = vld [vmem:[#allocation2 + $0xd8] sm:$0xff]  ;;  %v894_v10 = vpack.c.bf16 %v56_v2, %v54_v1 }
  0x23   :  { %887 = vmatpush1.bf16.msra.mxu1 %v886_v50  ;;  %v123_v8 = vld [vmem:[#allocation2 + $0x2c8] sm:$0xff]  ;;  %v125_v9 = vld [vmem:[#allocation2 + $0x2d8] sm:$0xff]  ;;  %v958_v11 = vpack.c.bf16 %v120_v5, %v118_v3  ;;  %v896_v12 = vpack.c.bf16 %v61_v7, %v59_v6  ;;  %v58_v13 = vld [vmem:[#allocation2 + $0xc0] sm:$0xff] }
  0x24   :  { %951 = vmatpush1.bf16.msra.mxu0 %v950_v51  ;;  %889 = vmatprep.subr.bf16.mxu1 %v888_v52  ;;  %v60_v14 = vld [vmem:[#allocation2 + $0xd0] sm:$0xff]  ;;  %v122_v15 = vld [vmem:[#allocation2 + $0x2c0] sm:$0xff]  ;;  %v960_v16 = vpack.c.bf16 %v125_v9, %v123_v8  ;;  %v63_v18 = vld [vmem:[#allocation2 + $0xe8] sm:$0xff] }
  0x25   :  { %953 = vmatprep.subr.bf16.mxu0 %v952_v56  ;;  %v124_v17 = vld [vmem:[#allocation2 + $0x2d0] sm:$0xff]  ;;  %v65_v19 = vld [vmem:[#allocation2 + $0xf8] sm:$0xff]  ;;  %v127_v20 = vld [vmem:[#allocation2 + $0x2e8] sm:$0xff]  ;;  %v898_v22 = vpack.c.bf16 %v60_v14, %v58_v13 }
  0x26   :  { %v129_v21 = vld [vmem:[#allocation2 + $0x2f8] sm:$0xff]  ;;  %v962_v23 = vpack.c.bf16 %v124_v17, %v122_v15  ;;  %v900_v24 = vpack.c.bf16 %v65_v19, %v63_v18  ;;  %v62_v25 = vld [vmem:[#allocation2 + $0xe0] sm:$0xff]  ;;  %v64_v26 = vld [vmem:[#allocation2 + $0xf0] sm:$0xff] }
  0x27   :  { %891 = vmatpush1.bf16.msra.mxu1 %v890_v62  ;;  %v126_v27 = vld [vmem:[#allocation2 + $0x2e0] sm:$0xff]  ;;  %v964_v28 = vpack.c.bf16 %v129_v21, %v127_v20  ;;  %v128_v29 = vld [vmem:[#allocation2 + $0x2f0] sm:$0xff]  ;;  %v67_v30 = vld [vmem:[#allocation2 + $0x108] sm:$0xff]  ;;  %v902_v34 = vpack.c.bf16 %v64_v26, %v62_v25 }
  0x28   :  { %955 = vmatpush1.bf16.msra.mxu0 %v954_v63  ;;  %893 = vmatprep.subr.bf16.mxu1 %v892_v0  ;;  %v69_v31 = vld [vmem:[#allocation2 + $0x118] sm:$0xff]  ;;  %v131_v32 = vld [vmem:[#allocation2 + $0x308] sm:$0xff]  ;;  %v966_v35 = vpack.c.bf16 %v128_v29, %v126_v27  ;;  %v66_v37 = vld [vmem:[#allocation2 + $0x100] sm:$0xff] }
  0x29   :  { %957 = vmatprep.subr.bf16.mxu0 %v956_v4  ;;  %v133_v33 = vld [vmem:[#allocation2 + $0x318] sm:$0xff]  ;;  %v904_v36 = vpack.c.bf16 %v69_v31, %v67_v30  ;;  %v68_v38 = vld [vmem:[#allocation2 + $0x110] sm:$0xff]  ;;  %v130_v39 = vld [vmem:[#allocation2 + $0x300] sm:$0xff] }
  0x2a   :  { %v968_v40 = vpack.c.bf16 %v133_v33, %v131_v32  ;;  %v132_v41 = vld [vmem:[#allocation2 + $0x310] sm:$0xff]  ;;  %v71_v42 = vld [vmem:[#allocation2 + $0x128] sm:$0xff]  ;;  %v73_v43 = vld [vmem:[#allocation2 + $0x138] sm:$0xff]  ;;  %v906_v46 = vpack.c.bf16 %v68_v38, %v66_v37 }
  0x2b   :  { %895 = vmatpush1.bf16.msra.mxu1 %v894_v10  ;;  %v135_v44 = vld [vmem:[#allocation2 + $0x328] sm:$0xff]  ;;  %v137_v45 = vld [vmem:[#allocation2 + $0x338] sm:$0xff]  ;;  %v970_v47 = vpack.c.bf16 %v132_v41, %v130_v39  ;;  %v908_v48 = vpack.c.bf16 %v73_v43, %v71_v42  ;;  %v70_v49 = vld [vmem:[#allocation2 + $0x120] sm:$0xff] }
  0x2c   :  { %959 = vmatpush1.bf16.msra.mxu0 %v958_v11  ;;  %897 = vmatprep.subr.bf16.mxu1 %v896_v12  ;;  %v72_v50 = vld [vmem:[#allocation2 + $0x130] sm:$0xff]  ;;  %v134_v51 = vld [vmem:[#allocation2 + $0x320] sm:$0xff]  ;;  %v972_v52 = vpack.c.bf16 %v137_v45, %v135_v44  ;;  %v75_v54 = vld [vmem:[#allocation2 + $0x148] sm:$0xff] }
  0x2d   :  { %961 = vmatprep.subr.bf16.mxu0 %v960_v16  ;;  %v136_v53 = vld [vmem:[#allocation2 + $0x330] sm:$0xff]  ;;  %v77_v55 = vld [vmem:[#allocation2 + $0x158] sm:$0xff]  ;;  %v139_v56 = vld [vmem:[#allocation2 + $0x348] sm:$0xff]  ;;  %v910_v58 = vpack.c.bf16 %v72_v50, %v70_v49 }
  0x2e   :  { %v141_v57 = vld [vmem:[#allocation2 + $0x358] sm:$0xff]  ;;  %v974_v59 = vpack.c.bf16 %v136_v53, %v134_v51  ;;  %v912_v60 = vpack.c.bf16 %v77_v55, %v75_v54  ;;  %v74_v61 = vld [vmem:[#allocation2 + $0x140] sm:$0xff]  ;;  %v76_v62 = vld [vmem:[#allocation2 + $0x150] sm:$0xff] }
  0x2f   :  { %899 = vmatpush1.bf16.msra.mxu1 %v898_v22  ;;  %v138_v63 = vld [vmem:[#allocation2 + $0x340] sm:$0xff]  ;;  %v976_v0 = vpack.c.bf16 %v141_v57, %v139_v56  ;;  %v140_v1 = vld [vmem:[#allocation2 + $0x350] sm:$0xff]  ;;  %v79_v2 = vld [vmem:[#allocation2 + $0x168] sm:$0xff]  ;;  %v914_v6 = vpack.c.bf16 %v76_v62, %v74_v61 }
  0x30   :  { %963 = vmatpush1.bf16.msra.mxu0 %v962_v23  ;;  %901 = vmatprep.subr.bf16.mxu1 %v900_v24  ;;  %v81_v3 = vld [vmem:[#allocation2 + $0x178] sm:$0xff]  ;;  %v143_v4 = vld [vmem:[#allocation2 + $0x368] sm:$0xff]  ;;  %v78_v7 = vld [vmem:[#allocation2 + $0x160] sm:$0xff]  ;;  %v978_v8 = vpack.c.bf16 %v140_v1, %v138_v63 }
  0x31   :  { %965 = vmatprep.subr.bf16.mxu0 %v964_v28  ;;  %v145_v5 = vld [vmem:[#allocation2 + $0x378] sm:$0xff]  ;;  %v916_v9 = vpack.c.bf16 %v81_v3, %v79_v2  ;;  %v80_v10 = vld [vmem:[#allocation2 + $0x170] sm:$0xff]  ;;  %v142_v11 = vld [vmem:[#allocation2 + $0x360] sm:$0xff] }
  0x32   :  { %v144_v12 = vld [vmem:[#allocation2 + $0x370] sm:$0xff]  ;;  %v980_v13 = vpack.c.bf16 %v145_v5, %v143_v4  ;;  %v83_v14 = vld [vmem:[#allocation2 + $0x188] sm:$0xff]  ;;  %v85_v15 = vld [vmem:[#allocation2 + $0x198] sm:$0xff]  ;;  %v918_v20 = vpack.c.bf16 %v80_v10, %v78_v7 }
  0x33   :  { %903 = vmatpush1.bf16.msra.mxu1 %v902_v34  ;;  %v1323_v16 = vld [vmem:[%s1371_s0 + $0x8] sm:$0xff]  ;;  %v149_v18 = vld [vmem:[#allocation2 + $0x398] sm:$0xff]  ;;  %v982_v21 = vpack.c.bf16 %v144_v12, %v142_v11  ;;  %v920_v22 = vpack.c.bf16 %v85_v15, %v83_v14  ;;  %v82_v23 = vld [vmem:[#allocation2 + $0x180] sm:$0xff] }
  0x34   :  { %967 = vmatpush1.bf16.msra.mxu0 %v966_v35  ;;  %905 = vmatprep.subr.bf16.mxu1 %v904_v36  ;;  %v147_v17 = vld [vmem:[#allocation2 + $0x388] sm:$0xff]  ;;  %v1329_v19 = vld [vmem:[%s1371_s0 + $0x18] sm:$0xff]  ;;  %v84_v24 = vld [vmem:[#allocation2 + $0x190] sm:$0xff] }
  0x35   :  { %969 = vmatprep.subr.bf16.mxu0 %v968_v40  ;;  %226 = vmatprep.mubr.f32.mxu1 %v1323_v16  ;;  %v146_v25 = vld [vmem:[#allocation2 + $0x380] sm:$0xff]  ;;  %v984_v26 = vpack.c.bf16 %v149_v18, %v147_v17  ;;  %v148_v27 = vld [vmem:[#allocation2 + $0x390] sm:$0xff]  ;;  %v87_v28 = vld [vmem:[#allocation2 + $0x1a8] sm:$0xff]  ;;  %v922_v32 = vpack.c.bf16 %v84_v24, %v82_v23 }
  0x36   :  { %297 = vmatprep.mubr.f32.mxu0 %v1329_v19  ;;  %v89_v29 = vld [vmem:[#allocation2 + $0x1b8] sm:$0xff]  ;;  %v151_v30 = vld [vmem:[#allocation2 + $0x3a8] sm:$0xff]  ;;  %v986_v33 = vpack.c.bf16 %v148_v27, %v146_v25  ;;  %v86_v35 = vld [vmem:[#allocation2 + $0x1a0] sm:$0xff] }
  0x37   :  { %907 = vmatpush1.bf16.msra.mxu1 %v906_v46  ;;  %v153_v31 = vld [vmem:[#allocation2 + $0x3b8] sm:$0xff]  ;;  %v924_v34 = vpack.c.bf16 %v89_v29, %v87_v28  ;;  %v88_v36 = vld [vmem:[#allocation2 + $0x1b0] sm:$0xff]  ;;  %v150_v37 = vld [vmem:[#allocation2 + $0x3a0] sm:$0xff] }
  0x38   :  { %971 = vmatpush1.bf16.msra.mxu0 %v970_v47  ;;  %909 = vmatprep.subr.bf16.mxu1 %v908_v48  ;;  %v988_v38 = vpack.c.bf16 %v153_v31, %v151_v30  ;;  %v152_v39 = vld [vmem:[#allocation2 + $0x3b0] sm:$0xff]  ;;  %v91_v40 = vld [vmem:[#allocation2 + $0x1c8] sm:$0xff]  ;;  %v93_v41 = vld [vmem:[#allocation2 + $0x1d8] sm:$0xff]  ;;  %v926_v44 = vpack.c.bf16 %v88_v36, %v86_v35 }
  0x39   :  { %973 = vmatprep.subr.bf16.mxu0 %v972_v52  ;;  %v155_v42 = vld [vmem:[#allocation2 + $0x3c8] sm:$0xff]  ;;  %v157_v43 = vld [vmem:[#allocation2 + $0x3d8] sm:$0xff]  ;;  %v990_v45 = vpack.c.bf16 %v152_v39, %v150_v37  ;;  %v928_v46 = vpack.c.bf16 %v93_v41, %v91_v40  ;;  %v90_v47 = vld [vmem:[#allocation2 + $0x1c0] sm:$0xff] }
  0x3a   :  { %v92_v48 = vld [vmem:[#allocation2 + $0x1d0] sm:$0xff]  ;;  %v154_v49 = vld [vmem:[#allocation2 + $0x3c0] sm:$0xff]  ;;  %v992_v50 = vpack.c.bf16 %v157_v43, %v155_v42  ;;  %v95_v52 = vld [vmem:[#allocation2 + $0x1e8] sm:$0xff] }
  0x3b   :  { %911 = vmatpush1.bf16.msra.mxu1 %v910_v58  ;;  %v156_v51 = vld [vmem:[#allocation2 + $0x3d0] sm:$0xff]  ;;  %v97_v53 = vld [vmem:[#allocation2 + $0x1f8] sm:$0xff]  ;;  %v159_v54 = vld [vmem:[#allocation2 + $0x3e8] sm:$0xff]  ;;  %v930_v56 = vpack.c.bf16 %v92_v48, %v90_v47 }
  0x3c   :  { %975 = vmatpush1.bf16.msra.mxu0 %v974_v59  ;;  %913 = vmatprep.subr.bf16.mxu1 %v912_v60  ;;  %v161_v55 = vld [vmem:[#allocation2 + $0x3f8] sm:$0xff]  ;;  %v994_v57 = vpack.c.bf16 %v156_v51, %v154_v49  ;;  %v932_v58 = vpack.c.bf16 %v97_v53, %v95_v52  ;;  %v94_v59 = vld [vmem:[#allocation2 + $0x1e0] sm:$0xff]  ;;  %v96_v60 = vld [vmem:[#allocation2 + $0x1f0] sm:$0xff] }
  0x3d   :  { %977 = vmatprep.subr.bf16.mxu0 %v976_v0  ;;  %v158_v61 = vld [vmem:[#allocation2 + $0x3e0] sm:$0xff]  ;;  %v996_v62 = vpack.c.bf16 %v161_v55, %v159_v54  ;;  %v160_v63 = vld [vmem:[#allocation2 + $0x3f0] sm:$0xff]  ;;  %v306_v0 = vld [vmem:[#allocation2 + $0x408] sm:$0xff]  ;;  %v934_v4 = vpack.c.bf16 %v96_v60, %v94_v59 }
  0x3e   :  { %v308_v1 = vld [vmem:[#allocation2 + $0x418] sm:$0xff]  ;;  %v581_v2 = vld [vmem:[#allocation2 + $0x808] sm:$0xff]  ;;  %v998_v5 = vpack.c.bf16 %v160_v63, %v158_v61  ;;  %v305_v7 = vld [vmem:[#allocation2 + $0x400] sm:$0xff] }
  0x3f   :  { %915 = vmatpush1.bf16.msra.mxu1 %v914_v6  ;;  %v583_v3 = vld [vmem:[#allocation2 + $0x818] sm:$0xff]  ;;  %v1000_v6 = vpack.c.bf16 %v308_v1, %v306_v0  ;;  %v582_v11 = vld [vmem:[#allocation2 + $0x810] sm:$0xff]  ;;  %v310_v12 = vld [vmem:[#allocation2 + $0x428] sm:$0xff] }
  0x40   :  { %979 = vmatpush1.bf16.msra.mxu0 %v978_v8  ;;  %917 = vmatprep.subr.bf16.mxu1 %v916_v9  ;;  %v307_v8 = vld [vmem:[#allocation2 + $0x410] sm:$0xff]  ;;  %v580_v9 = vld [vmem:[#allocation2 + $0x800] sm:$0xff]  ;;  %v1128_v10 = vpack.c.bf16 %v583_v3, %v581_v2  ;;  %v585_v14 = vld [vmem:[#allocation2 + $0x828] sm:$0xff] }
  0x41   :  { %981 = vmatprep.subr.bf16.mxu0 %v980_v13  ;;  %v312_v13 = vld [vmem:[#allocation2 + $0x438] sm:$0xff]  ;;  %v867_v17 = vld [vmem:[%s1371_s0 + $0x28] sm:$0xff]  ;;  %v1338_v18 = vld [vmem:[%s1371_s0] sm:$0xff] }
  0x42   :  { %v587_v15 = vld [vmem:[#allocation2 + $0x838] sm:$0xff]  ;;  %v1004_v23 = vpack.c.bf16 %v312_v13, %v310_v12  ;;  %v309_v24 = vld [vmem:[#allocation2 + $0x420] sm:$0xff]  ;;  %v311_v25 = vld [vmem:[#allocation2 + $0x430] sm:$0xff]  ;;  %v576_v31 = vadd.f32 %v867_v17, %v1323_v16 }
  0x43   :  { %919 = vmatpush1.bf16.msra.mxu1 %v918_v20  ;;  %v27_v20 = vld [vmem:[%s1371_s0 + $0x10] sm:$0xff]  ;;  %v1132_v27 = vpack.c.bf16 %v587_v15, %v585_v14  ;;  %v314_v29 = vld [vmem:[#allocation2 + $0x448] sm:$0xff]  ;;  %v316_v30 = vld [vmem:[#allocation2 + $0x458] sm:$0xff] }
  0x44   :  { %983 = vmatpush1.bf16.msra.mxu0 %v982_v21  ;;  %921 = vmatprep.subr.bf16.mxu1 %v920_v22  ;;  %v1002_v21 = vpack.c.bf16 %v307_v8, %v305_v7  ;;  %v1130_v22 = vpack.c.bf16 %v582_v11, %v580_v9  ;;  %v586_v28 = vld [vmem:[#allocation2 + $0x830] sm:$0xff]  ;;  %v1008_v36 = vpack.c.bf16 %v316_v30, %v314_v29  ;;  %v313_v37 = vld [vmem:[#allocation2 + $0x440] sm:$0xff]  ;;  %v318_v42 = vld [vmem:[#allocation2 + $0x468] sm:$0xff] }
  0x45   :  { %985 = vmatprep.subr.bf16.mxu0 %v984_v26  ;;  %v584_v26 = vld [vmem:[#allocation2 + $0x820] sm:$0xff]  ;;  %v590_v41 = vld [vmem:[#allocation2 + $0x850] sm:$0xff]  ;;  %v320_v43 = vld [vmem:[#allocation2 + $0x478] sm:$0xff] }
  0x46   :  { %v1134_v35 = vpack.c.bf16 %v586_v28, %v584_v26  ;;  %v588_v39 = vld [vmem:[#allocation2 + $0x840] sm:$0xff]  ;;  %v593_v16 = vld [vmem:[#allocation2 + $0x868] sm:$0xff]  ;;  %v1012_v47 = vpack.c.bf16 %v320_v43, %v318_v42  ;;  %v319_v49 = vld [vmem:[#allocation2 + $0x470] sm:$0xff] }
  0x47   :  { %923 = vmatpush1.bf16.msra.mxu1 %v922_v32  ;;  %v589_v32 = vld [vmem:[#allocation2 + $0x848] sm:$0xff]  ;;  %v317_v48 = vld [vmem:[#allocation2 + $0x460] sm:$0xff]  ;;  %v594_v52 = vld [vmem:[#allocation2 + $0x870] sm:$0xff] }
  0x48   :  { %987 = vmatpush1.bf16.msra.mxu0 %v986_v33  ;;  %925 = vmatprep.subr.bf16.mxu1 %v924_v34  ;;  %v591_v33 = vld [vmem:[#allocation2 + $0x858] sm:$0xff]  ;;  %v1006_v34 = vpack.c.bf16 %v311_v25, %v309_v24  ;;  %v322_v53 = vld [vmem:[#allocation2 + $0x488] sm:$0xff]  ;;  %v321_v60 = vld [vmem:[#allocation2 + $0x480] sm:$0xff] }
  0x49   :  { %989 = vmatprep.subr.bf16.mxu0 %v988_v38  ;;  %v315_v38 = vld [vmem:[#allocation2 + $0x450] sm:$0xff]  ;;  %v1136_v40 = vpack.c.bf16 %v591_v33, %v589_v32  ;;  %v324_v54 = vld [vmem:[#allocation2 + $0x498] sm:$0xff]  ;;  %v597_v55 = vld [vmem:[#allocation2 + $0x888] sm:$0xff] }
  0x4a   :  { %v1016_v59 = vpack.c.bf16 %v324_v54, %v322_v53  ;;  %v323_v61 = vld [vmem:[#allocation2 + $0x490] sm:$0xff]  ;;  %v326_v1 = vld [vmem:[#allocation2 + $0x4a8] sm:$0xff]  ;;  %v328_v2 = vld [vmem:[#allocation2 + $0x4b8] sm:$0xff] }
  0x4b   :  { %927 = vmatpush1.bf16.msra.mxu1 %v926_v44  ;;  %v595_v44 = vld [vmem:[#allocation2 + $0x878] sm:$0xff]  ;;  %v598_v0 = vld [vmem:[#allocation2 + $0x890] sm:$0xff]  ;;  %v601_v3 = vld [vmem:[#allocation2 + $0x8a8] sm:$0xff]  ;;  %v1020_v7 = vpack.c.bf16 %v328_v2, %v326_v1 }
  0x4c   :  { %991 = vmatpush1.bf16.msra.mxu0 %v990_v45  ;;  %929 = vmatprep.subr.bf16.mxu1 %v928_v46  ;;  %v1010_v45 = vpack.c.bf16 %v315_v38, %v313_v37  ;;  %v1138_v46 = vpack.c.bf16 %v590_v41, %v588_v39  ;;  %v1140_v51 = vpack.c.bf16 %v595_v44, %v593_v16  ;;  %v325_v8 = vld [vmem:[#allocation2 + $0x4a0] sm:$0xff]  ;;  %v327_v9 = vld [vmem:[#allocation2 + $0x4b0] sm:$0xff]  ;;  %v330_v13 = vld [vmem:[#allocation2 + $0x4c8] sm:$0xff] }
  0x4d   :  { %993 = vmatprep.subr.bf16.mxu0 %v992_v50  ;;  %v592_v50 = vld [vmem:[#allocation2 + $0x860] sm:$0xff]  ;;  %v602_v12 = vld [vmem:[#allocation2 + $0x8b0] sm:$0xff]  ;;  %v332_v14 = vld [vmem:[#allocation2 + $0x4d8] sm:$0xff] }
  0x4e   :  { %v605_v15 = vld [vmem:[#allocation2 + $0x8c8] sm:$0xff]  ;;  %v331_v24 = vld [vmem:[#allocation2 + $0x4d0] sm:$0xff]  ;;  %v604_v25 = vld [vmem:[#allocation2 + $0x8c0] sm:$0xff] }
  0x4f   :  { %931 = vmatpush1.bf16.msra.mxu1 %v930_v56  ;;  %v599_v56 = vld [vmem:[#allocation2 + $0x898] sm:$0xff]  ;;  %v334_v28 = vld [vmem:[#allocation2 + $0x4e8] sm:$0xff]  ;;  %v608_v37 = vld [vmem:[#allocation2 + $0x8e0] sm:$0xff] }
  0x50   :  { %995 = vmatpush1.bf16.msra.mxu0 %v994_v57  ;;  %933 = vmatprep.subr.bf16.mxu1 %v932_v58  ;;  %v1014_v57 = vpack.c.bf16 %v319_v49, %v317_v48  ;;  %v1142_v58 = vpack.c.bf16 %v594_v52, %v592_v50  ;;  %v1144_v63 = vpack.c.bf16 %v599_v56, %v597_v55  ;;  %v336_v29 = vld [vmem:[#allocation2 + $0x4f8] sm:$0xff]  ;;  %v609_v30 = vld [vmem:[#allocation2 + $0x8e8] sm:$0xff]  ;;  %v610_v39 = vld [vmem:[#allocation2 + $0x8f0] sm:$0xff] }
  0x51   :  { %997 = vmatprep.subr.bf16.mxu0 %v996_v62  ;;  %v596_v62 = vld [vmem:[#allocation2 + $0x880] sm:$0xff]  ;;  %v340_v41 = vld [vmem:[#allocation2 + $0x518] sm:$0xff]  ;;  %v613_v42 = vld [vmem:[#allocation2 + $0x908] sm:$0xff]  ;;  %v1158_v44 = vpack.c.bf16 %v610_v39, %v608_v37 }
  0x52   :  { %v615_v43 = vld [vmem:[#allocation2 + $0x918] sm:$0xff]  ;;  %v612_v48 = vld [vmem:[#allocation2 + $0x900] sm:$0xff]  ;;  %v614_v50 = vld [vmem:[#allocation2 + $0x910] sm:$0xff] }
  0x53   :  { %935 = vmatpush1.bf16.msra.mxu1 %v934_v4  ;;  %v603_v4 = vld [vmem:[#allocation2 + $0x8b8] sm:$0xff]  ;;  %v1160_v49 = vpack.c.bf16 %v615_v43, %v613_v42  ;;  %v617_v53 = vld [vmem:[#allocation2 + $0x928] sm:$0xff]  ;;  %v1162_v56 = vpack.c.bf16 %v614_v50, %v612_v48  ;;  %v630_v37 = vld [vmem:[#allocation2 + $0x990] sm:$0xff] }
  0x54   :  { %999 = vmatpush1.bf16.msra.mxu0 %v998_v5  ;;  %1001 = vmatprep.subr.bf16.mxu1 %v1000_v6  ;;  %v1018_v5 = vpack.c.bf16 %v323_v61, %v321_v60  ;;  %v1146_v6 = vpack.c.bf16 %v598_v0, %v596_v62  ;;  %v1148_v11 = vpack.c.bf16 %v603_v4, %v601_v3  ;;  %v344_v52 = vld [vmem:[#allocation2 + $0x538] sm:$0xff]  ;;  %v616_v60 = vld [vmem:[#allocation2 + $0x920] sm:$0xff]  ;;  %v618_v62 = vld [vmem:[#allocation2 + $0x930] sm:$0xff] }
  0x55   :  { %1129 = vmatprep.subr.bf16.mxu0 %v1128_v10  ;;  %v600_v10 = vld [vmem:[#allocation2 + $0x8a0] sm:$0xff]  ;;  %v619_v54 = vld [vmem:[#allocation2 + $0x938] sm:$0xff]  ;;  %v621_v1 = vld [vmem:[#allocation2 + $0x948] sm:$0xff]  ;;  %v1166_v4 = vpack.c.bf16 %v618_v62, %v616_v60 }
  0x56   :  { %227 = vmatmul.mubr.f32.vlgmr.msra.gmra.mrb[0].mxu1 %v1338_v18  ;;  %v1164_v61 = vpack.c.bf16 %v619_v54, %v617_v53  ;;  %v348_v0 = vld [vmem:[#allocation2 + $0x558] sm:$0xff]  ;;  %v634_v48 = vld [vmem:[#allocation2 + $0x9b0] sm:$0xff] }
  0x57   :  { %298 = vmatmul.mubr.f32.vlgmr.msra.gmra.mrb[0].mxu0 %v27_v20  ;;  %1003 = vmatpush1.bf16.msra.mxu1 %v1002_v21  ;;  %v1022_v20 = vpack.c.bf16 %v327_v9, %v325_v8  ;;  %v1150_v21 = vpack.c.bf16 %v602_v12, %v600_v10  ;;  %v623_v2 = vld [vmem:[#allocation2 + $0x958] sm:$0xff]  ;;  %v620_v8 = vld [vmem:[#allocation2 + $0x940] sm:$0xff]  ;;  %v622_v10 = vld [vmem:[#allocation2 + $0x950] sm:$0xff] }
  0x58   :  { %1131 = vmatpush1.bf16.msra.mxu0 %v1130_v22  ;;  %1005 = vmatprep.subr.bf16.mxu1 %v1004_v23  ;;  %v1024_v22 = vpack.c.bf16 %v332_v14, %v330_v13  ;;  %v329_v23 = vld [vmem:[#allocation2 + $0x4c0] sm:$0xff]  ;;  %v1168_v9 = vpack.c.bf16 %v623_v2, %v621_v1  ;;  %v352_v12 = vld [vmem:[#allocation2 + $0x578] sm:$0xff]  ;;  %v625_v13 = vld [vmem:[#allocation2 + $0x968] sm:$0xff] }
  0x59   :  { %1133 = vmatprep.subr.bf16.mxu0 %v1132_v27  ;;  %497 = vmatprep.mubr.f32.mxu1 %v867_v17  ;;  %v607_v17 = vld [vmem:[#allocation2 + $0x8d8] sm:$0xff]  ;;  %v606_v27 = vld [vmem:[#allocation2 + $0x8d0] sm:$0xff]  ;;  %v1026_v32 = vpack.c.bf16 %v331_v24, %v329_v23  ;;  %v624_v23 = vld [vmem:[#allocation2 + $0x960] sm:$0xff] }
  0x5a   :  { %772 = vmatprep.mubr.f32.mxu0 %v576_v31  ;;  %v1152_v26 = vpack.c.bf16 %v607_v17, %v605_v15  ;;  %v611_v31 = vld [vmem:[#allocation2 + $0x8f8] sm:$0xff]  ;;  %v1154_v33 = vpack.c.bf16 %v606_v27, %v604_v25  ;;  %v1170_v17 = vpack.c.bf16 %v622_v10, %v620_v8  ;;  %v626_v25 = vld [vmem:[#allocation2 + $0x970] sm:$0xff] }
  0x5b   :  { %1007 = vmatpush1.bf16.msra.mxu1 %v1006_v34  ;;  %v1028_v34 = vpack.c.bf16 %v336_v29, %v334_v28  ;;  %v1156_v38 = vpack.c.bf16 %v611_v31, %v609_v30  ;;  %v627_v14 = vld [vmem:[#allocation2 + $0x978] sm:$0xff]  ;;  %v629_v28 = vld [vmem:[#allocation2 + $0x988] sm:$0xff]  ;;  %v1174_v31 = vpack.c.bf16 %v626_v25, %v624_v23  ;;  %v638_v60 = vld [vmem:[#allocation2 + $0x9d0] sm:$0xff] }
  0x5c   :  { %1135 = vmatpush1.bf16.msra.mxu0 %v1134_v35  ;;  %1009 = vmatprep.subr.bf16.mxu1 %v1008_v36  ;;  %v333_v35 = vld [vmem:[#allocation2 + $0x4e0] sm:$0xff]  ;;  %v335_v36 = vld [vmem:[#allocation2 + $0x4f0] sm:$0xff]  ;;  %v1172_v24 = vpack.c.bf16 %v627_v14, %v625_v13  ;;  %v356_v27 = vld [vmem:[#allocation2 + $0x598] sm:$0xff] }
  0x5d   :  { %1137 = vmatprep.subr.bf16.mxu0 %v1136_v40  ;;  %v338_v40 = vld [vmem:[#allocation2 + $0x508] sm:$0xff]  ;;  %v1030_v16 = vpack.c.bf16 %v335_v36, %v333_v35  ;;  %v631_v29 = vld [vmem:[#allocation2 + $0x998] sm:$0xff]  ;;  %v628_v35 = vld [vmem:[#allocation2 + $0x980] sm:$0xff] }
  0x5e   :  { %v1176_v36 = vpack.c.bf16 %v631_v29, %v629_v28  ;;  %v360_v39 = vld [vmem:[#allocation2 + $0x5b8] sm:$0xff]  ;;  %v1178_v43 = vpack.c.bf16 %v630_v37, %v628_v35  ;;  %v642_v8 = vld [vmem:[#allocation2 + $0x9f0] sm:$0xff]  ;;  %v866_v13 = vld [vmem:[%s1371_s0 + $0x20] sm:$0xff] }
  0x5f   :  { %1011 = vmatpush1.bf16.msra.mxu1 %v1010_v45  ;;  %v1032_v45 = vpack.c.bf16 %v340_v41, %v338_v40  ;;  %v633_v40 = vld [vmem:[#allocation2 + $0x9a8] sm:$0xff]  ;;  %v635_v41 = vld [vmem:[#allocation2 + $0x9b8] sm:$0xff]  ;;  %v375_v35 = vld [vmem:[#allocation2 + $0x630] sm:$0xff] }
  0x60   :  { %1139 = vmatpush1.bf16.msra.mxu0 %v1138_v46  ;;  %1013 = vmatprep.subr.bf16.mxu1 %v1012_v47  ;;  %v337_v46 = vld [vmem:[#allocation2 + $0x500] sm:$0xff]  ;;  %v339_v47 = vld [vmem:[#allocation2 + $0x510] sm:$0xff]  ;;  %v364_v50 = vld [vmem:[#allocation2 + $0x5d8] sm:$0xff] }
  0x61   :  { %1141 = vmatprep.subr.bf16.mxu0 %v1140_v51  ;;  %v342_v51 = vld [vmem:[#allocation2 + $0x528] sm:$0xff]  ;;  %v1034_v55 = vpack.c.bf16 %v339_v47, %v337_v46  ;;  %v632_v46 = vld [vmem:[#allocation2 + $0x9a0] sm:$0xff]  ;;  %v1180_v47 = vpack.c.bf16 %v635_v41, %v633_v40  ;;  %v368_v62 = vld [vmem:[#allocation2 + $0x5f8] sm:$0xff] }
  0x62   :  { %v1182_v54 = vpack.c.bf16 %v634_v48, %v632_v46  ;;  %v372_v10 = vld [vmem:[#allocation2 + $0x618] sm:$0xff]  ;;  %v374_v25 = vld [vmem:[#allocation2 + $0x628] sm:$0xff]  ;;  %v379_v46 = vld [vmem:[#allocation2 + $0x650] sm:$0xff] }
  0x63   :  { %1015 = vmatpush1.bf16.msra.mxu1 %v1014_v57  ;;  %v1036_v57 = vpack.c.bf16 %v344_v52, %v342_v51  ;;  %v637_v51 = vld [vmem:[#allocation2 + $0x9c8] sm:$0xff]  ;;  %v639_v52 = vld [vmem:[#allocation2 + $0x9d8] sm:$0xff] }
  0x64   :  { %1143 = vmatpush1.bf16.msra.mxu0 %v1142_v58  ;;  %1017 = vmatprep.subr.bf16.mxu1 %v1016_v59  ;;  %v341_v58 = vld [vmem:[#allocation2 + $0x520] sm:$0xff]  ;;  %v343_v59 = vld [vmem:[#allocation2 + $0x530] sm:$0xff]  ;;  %v651_v28 = vld [vmem:[#allocation2 + $0xa38] sm:$0xff] }
  0x65   :  { %1145 = vmatprep.subr.bf16.mxu0 %v1144_v63  ;;  %v346_v63 = vld [vmem:[#allocation2 + $0x548] sm:$0xff]  ;;  %v1038_v3 = vpack.c.bf16 %v343_v59, %v341_v58  ;;  %v636_v58 = vld [vmem:[#allocation2 + $0x9c0] sm:$0xff]  ;;  %v1184_v59 = vpack.c.bf16 %v639_v52, %v637_v51  ;;  %v869_v29 = vld [vmem:[%s1371_s0 + $0x38] sm:$0xff] }
  0x66   :  { %v1186_v2 = vpack.c.bf16 %v638_v60, %v636_v58  ;;  %v380_v40 = vld [vmem:[#allocation2 + $0x658] sm:$0xff]  ;;  %v578_v41 = vadd.f32 %v869_v29, %v1329_v19  ;;  %v657_v19 = vld [vmem:[#allocation2 + $0xa68] sm:$0xff]  ;;  %v656_v58 = vld [vmem:[#allocation2 + $0xa60] sm:$0xff] }
  0x67   :  { %1019 = vmatpush1.bf16.msra.mxu1 %v1018_v5  ;;  %v1040_v5 = vpack.c.bf16 %v348_v0, %v346_v63  ;;  %v641_v63 = vld [vmem:[#allocation2 + $0x9e8] sm:$0xff]  ;;  %v643_v0 = vld [vmem:[#allocation2 + $0x9f8] sm:$0xff]  ;;  %v658_v60 = vld [vmem:[#allocation2 + $0xa70] sm:$0xff] }
  0x68   :  { %1147 = vmatpush1.bf16.msra.mxu0 %v1146_v6  ;;  %1021 = vmatprep.subr.bf16.mxu1 %v1020_v7  ;;  %v345_v6 = vld [vmem:[#allocation2 + $0x540] sm:$0xff]  ;;  %v347_v7 = vld [vmem:[#allocation2 + $0x550] sm:$0xff]  ;;  %v384_v51 = vld [vmem:[#allocation2 + $0x678] sm:$0xff] }
  0x69   :  { %1149 = vmatprep.subr.bf16.mxu0 %v1148_v11  ;;  %v350_v11 = vld [vmem:[#allocation2 + $0x568] sm:$0xff]  ;;  %v1042_v15 = vpack.c.bf16 %v347_v7, %v345_v6  ;;  %v640_v6 = vld [vmem:[#allocation2 + $0x9e0] sm:$0xff]  ;;  %v1188_v7 = vpack.c.bf16 %v643_v0, %v641_v63  ;;  %v659_v52 = vld [vmem:[#allocation2 + $0xa78] sm:$0xff] }
  0x6a   :  { %v661_v63 = vld [vmem:[#allocation2 + $0xa88] sm:$0xff]  ;;  %v663_v0 = vld [vmem:[#allocation2 + $0xa98] sm:$0xff] }
  0x6b   :  { %1023 = vmatpush1.bf16.msra.mxu1 %v1022_v20  ;;  %v1044_v20 = vpack.c.bf16 %v352_v12, %v350_v11  ;;  %v645_v11 = vld [vmem:[#allocation2 + $0xa08] sm:$0xff]  ;;  %v647_v12 = vld [vmem:[#allocation2 + $0xa18] sm:$0xff] }
  0x6c   :  { %1151 = vmatpush1.bf16.msra.mxu0 %v1150_v21  ;;  %1025 = vmatprep.subr.bf16.mxu1 %v1024_v22  ;;  %v349_v21 = vld [vmem:[#allocation2 + $0x560] sm:$0xff]  ;;  %v351_v22 = vld [vmem:[#allocation2 + $0x570] sm:$0xff]  ;;  %v1192_v23 = vpack.c.bf16 %v647_v12, %v645_v11  ;;  %v665_v11 = vld [vmem:[#allocation2 + $0xaa8] sm:$0xff] }
  0x6d   :  { %1153 = vmatprep.subr.bf16.mxu0 %v1152_v26  ;;  %v354_v26 = vld [vmem:[#allocation2 + $0x588] sm:$0xff]  ;;  %v1046_v30 = vpack.c.bf16 %v351_v22, %v349_v21  ;;  %v371_v21 = vld [vmem:[#allocation2 + $0x610] sm:$0xff]  ;;  %v644_v22 = vld [vmem:[#allocation2 + $0xa00] sm:$0xff] }
  0x6e   :  { %v667_v12 = vld [vmem:[#allocation2 + $0xab8] sm:$0xff] }
  0x6f   :  { %1027 = vmatpush1.bf16.msra.mxu1 %v1026_v32  ;;  %v1048_v32 = vpack.c.bf16 %v356_v27, %v354_v26  ;;  %v376_v26 = vld [vmem:[#allocation2 + $0x638] sm:$0xff]  ;;  %v649_v27 = vld [vmem:[#allocation2 + $0xa28] sm:$0xff] }
  0x70   :  { %1155 = vmatpush1.bf16.msra.mxu0 %v1154_v33  ;;  %1029 = vmatprep.subr.bf16.mxu1 %v1028_v34  ;;  %v353_v33 = vld [vmem:[#allocation2 + $0x580] sm:$0xff]  ;;  %v355_v34 = vld [vmem:[#allocation2 + $0x590] sm:$0xff]  ;;  %v1196_v37 = vpack.c.bf16 %v651_v28, %v649_v27  ;;  %v671_v27 = vld [vmem:[#allocation2 + $0xad8] sm:$0xff] }
  0x71   :  { %1157 = vmatprep.subr.bf16.mxu0 %v1156_v38  ;;  %v358_v38 = vld [vmem:[#allocation2 + $0x5a8] sm:$0xff]  ;;  %v1050_v42 = vpack.c.bf16 %v355_v34, %v353_v33  ;;  %v1068_v33 = vpack.c.bf16 %v376_v26, %v374_v25  ;;  %v373_v34 = vld [vmem:[#allocation2 + $0x620] sm:$0xff]  ;;  %v396_v25 = vld [vmem:[#allocation2 + $0x6d8] sm:$0xff] }
  0x72   :  { %v669_v26 = vld [vmem:[#allocation2 + $0xac8] sm:$0xff] }
  0x73   :  { %1031 = vmatpush1.bf16.msra.mxu1 %v1030_v16  ;;  %v1052_v16 = vpack.c.bf16 %v360_v39, %v358_v38  ;;  %v650_v38 = vld [vmem:[#allocation2 + $0xa30] sm:$0xff]  ;;  %v378_v39 = vld [vmem:[#allocation2 + $0x648] sm:$0xff] }
  0x74   :  { %1159 = vmatpush1.bf16.msra.mxu0 %v1158_v44  ;;  %1033 = vmatprep.subr.bf16.mxu1 %v1032_v45  ;;  %v357_v44 = vld [vmem:[#allocation2 + $0x5a0] sm:$0xff]  ;;  %v359_v45 = vld [vmem:[#allocation2 + $0x5b0] sm:$0xff] }
  0x75   :  { %1161 = vmatprep.subr.bf16.mxu0 %v1160_v49  ;;  %v362_v49 = vld [vmem:[#allocation2 + $0x5c8] sm:$0xff]  ;;  %v1054_v53 = vpack.c.bf16 %v359_v45, %v357_v44  ;;  %v1072_v44 = vpack.c.bf16 %v380_v40, %v378_v39  ;;  %v377_v45 = vld [vmem:[#allocation2 + $0x640] sm:$0xff]  ;;  %v675_v39 = vld [vmem:[#allocation2 + $0xaf8] sm:$0xff] }
  0x77   :  { %1035 = vmatpush1.bf16.msra.mxu1 %v1034_v55  ;;  %v1056_v55 = vpack.c.bf16 %v364_v50, %v362_v49  ;;  %v654_v49 = vld [vmem:[#allocation2 + $0xa50] sm:$0xff]  ;;  %v382_v50 = vld [vmem:[#allocation2 + $0x668] sm:$0xff] }
  0x78   :  { %1163 = vmatpush1.bf16.msra.mxu0 %v1162_v56  ;;  %1037 = vmatprep.subr.bf16.mxu1 %v1036_v57  ;;  %v361_v56 = vld [vmem:[#allocation2 + $0x5c0] sm:$0xff]  ;;  %v363_v57 = vld [vmem:[#allocation2 + $0x5d0] sm:$0xff] }
  0x79   :  { %1165 = vmatprep.subr.bf16.mxu0 %v1164_v61  ;;  %v366_v61 = vld [vmem:[#allocation2 + $0x5e8] sm:$0xff]  ;;  %v1058_v1 = vpack.c.bf16 %v363_v57, %v361_v56  ;;  %v381_v56 = vld [vmem:[#allocation2 + $0x660] sm:$0xff]  ;;  %v383_v57 = vld [vmem:[#allocation2 + $0x670] sm:$0xff] }
  0x7b   :  { %1039 = vmatpush1.bf16.msra.mxu1 %v1038_v3  ;;  %v1060_v3 = vpack.c.bf16 %v368_v62, %v366_v61  ;;  %v386_v61 = vld [vmem:[#allocation2 + $0x688] sm:$0xff]  ;;  %v388_v62 = vld [vmem:[#allocation2 + $0x698] sm:$0xff] }
  0x7c   :  { %1167 = vmatpush1.bf16.msra.mxu0 %v1166_v4  ;;  %1041 = vmatprep.subr.bf16.mxu1 %v1040_v5  ;;  %v365_v4 = vld [vmem:[#allocation2 + $0x5e0] sm:$0xff]  ;;  %v367_v5 = vld [vmem:[#allocation2 + $0x5f0] sm:$0xff] }
  0x7d   :  { %1169 = vmatprep.subr.bf16.mxu0 %v1168_v9  ;;  %v370_v9 = vld [vmem:[#allocation2 + $0x608] sm:$0xff]  ;;  %v1062_v14 = vpack.c.bf16 %v367_v5, %v365_v4  ;;  %v385_v4 = vld [vmem:[#allocation2 + $0x680] sm:$0xff]  ;;  %v387_v5 = vld [vmem:[#allocation2 + $0x690] sm:$0xff] }
  0x7f   :  { %1043 = vmatpush1.bf16.msra.mxu1 %v1042_v15  ;;  %v1190_v15 = vpack.c.bf16 %v642_v8, %v640_v6  ;;  %v660_v6 = vld [vmem:[#allocation2 + $0xa80] sm:$0xff]  ;;  %v662_v8 = vld [vmem:[#allocation2 + $0xa90] sm:$0xff] }
  0x80   :  { %1171 = vmatpush1.bf16.msra.mxu0 %v1170_v17  ;;  %1045 = vmatprep.subr.bf16.mxu1 %v1044_v20  ;;  %v1064_v17 = vpack.c.bf16 %v372_v10, %v370_v9  ;;  %v369_v20 = vld [vmem:[#allocation2 + $0x600] sm:$0xff]  ;;  %v390_v9 = vld [vmem:[#allocation2 + $0x6a8] sm:$0xff]  ;;  %v392_v10 = vld [vmem:[#allocation2 + $0x6b8] sm:$0xff] }
  0x81   :  { %1173 = vmatprep.subr.bf16.mxu0 %v1172_v24  ;;  %v646_v24 = vld [vmem:[#allocation2 + $0xa10] sm:$0xff] }
  0x83   :  { %1047 = vmatpush1.bf16.msra.mxu1 %v1046_v30  ;;  %v575_v30 = vadd.f32 %v866_v13, %v1338_v18  ;;  %v1070_v18 = vpack.c.bf16 %v375_v35, %v373_v34  ;;  %v1216_v34 = vpack.c.bf16 %v671_v27, %v669_v26  ;;  %v670_v35 = vld [vmem:[#allocation2 + $0xad0] sm:$0xff]  ;;  %v413_v27 = vld [vmem:[#allocation2 + $0x760] sm:$0xff] }
  0x84   :  { %1175 = vmatpush1.bf16.msra.mxu0 %v1174_v31  ;;  %1049 = vmatprep.subr.bf16.mxu1 %v1048_v32  ;;  %v1066_v31 = vpack.c.bf16 %v371_v21, %v369_v20  ;;  %v1194_v32 = vpack.c.bf16 %v646_v24, %v644_v22  ;;  %v391_v20 = vld [vmem:[#allocation2 + $0x6b0] sm:$0xff]  ;;  %v664_v21 = vld [vmem:[#allocation2 + $0xaa0] sm:$0xff]  ;;  %v1212_v22 = vpack.c.bf16 %v667_v12, %v665_v11  ;;  %v394_v24 = vld [vmem:[#allocation2 + $0x6c8] sm:$0xff] }
  0x85   :  { %1177 = vmatprep.subr.bf16.mxu0 %v1176_v36  ;;  %v648_v36 = vld [vmem:[#allocation2 + $0xa20] sm:$0xff] }
  0x86   :  { %v409_v12 = vld [vmem:[#allocation2 + $0x740] sm:$0xff] }
  0x87   :  { %1051 = vmatpush1.bf16.msra.mxu1 %v1050_v42  ;;  %v653_v42 = vld [vmem:[#allocation2 + $0xa48] sm:$0xff] }
  0x88   :  { %1179 = vmatpush1.bf16.msra.mxu0 %v1178_v43  ;;  %1053 = vmatprep.subr.bf16.mxu1 %v1052_v16  ;;  %v655_v43 = vld [vmem:[#allocation2 + $0xa58] sm:$0xff]  ;;  %v1198_v16 = vpack.c.bf16 %v650_v38, %v648_v36  ;;  %v398_v36 = vld [vmem:[#allocation2 + $0x6e8] sm:$0xff] }
  0x89   :  { %1181 = vmatprep.subr.bf16.mxu0 %v1180_v47  ;;  %v652_v47 = vld [vmem:[#allocation2 + $0xa40] sm:$0xff]  ;;  %v1200_v48 = vpack.c.bf16 %v655_v43, %v653_v42  ;;  %v673_v38 = vld [vmem:[#allocation2 + $0xae8] sm:$0xff] }
  0x8a   :  { %v397_v43 = vld [vmem:[#allocation2 + $0x6e0] sm:$0xff] }
  0x8b   :  { %1055 = vmatpush1.bf16.msra.mxu1 %v1054_v53  ;;  %v1074_v53 = vpack.c.bf16 %v379_v46, %v377_v45  ;;  %v674_v45 = vld [vmem:[#allocation2 + $0xaf0] sm:$0xff]  ;;  %v402_v46 = vld [vmem:[#allocation2 + $0x708] sm:$0xff] }
  0x8c   :  { %1183 = vmatpush1.bf16.msra.mxu0 %v1182_v54  ;;  %1057 = vmatprep.subr.bf16.mxu1 %v1056_v55  ;;  %v1202_v54 = vpack.c.bf16 %v654_v49, %v652_v47  ;;  %v1076_v55 = vpack.c.bf16 %v384_v51, %v382_v50  ;;  %v404_v47 = vld [vmem:[#allocation2 + $0x718] sm:$0xff] }
  0x8d   :  { %1185 = vmatprep.subr.bf16.mxu0 %v1184_v59  ;;  %v1204_v59 = vpack.c.bf16 %v659_v52, %v657_v19  ;;  %v679_v49 = vld [vmem:[#allocation2 + $0xb18] sm:$0xff]  ;;  %v1096_v19 = vpack.c.bf16 %v404_v47, %v402_v46  ;;  %v401_v52 = vld [vmem:[#allocation2 + $0x700] sm:$0xff] }
  0x8f   :  { %1059 = vmatpush1.bf16.msra.mxu1 %v1058_v1  ;;  %v1078_v1 = vpack.c.bf16 %v383_v57, %v381_v56  ;;  %v678_v56 = vld [vmem:[#allocation2 + $0xb10] sm:$0xff]  ;;  %v406_v57 = vld [vmem:[#allocation2 + $0x728] sm:$0xff] }
  0x90   :  { %1187 = vmatpush1.bf16.msra.mxu0 %v1186_v2  ;;  %1061 = vmatprep.subr.bf16.mxu1 %v1060_v3  ;;  %v1206_v2 = vpack.c.bf16 %v658_v60, %v656_v58  ;;  %v1080_v3 = vpack.c.bf16 %v388_v62, %v386_v61  ;;  %v408_v58 = vld [vmem:[#allocation2 + $0x738] sm:$0xff] }
  0x91   :  { %1189 = vmatprep.subr.bf16.mxu0 %v1188_v7  ;;  %v1208_v7 = vpack.c.bf16 %v663_v0, %v661_v63  ;;  %v683_v60 = vld [vmem:[#allocation2 + $0xb38] sm:$0xff]  ;;  %v1100_v63 = vpack.c.bf16 %v408_v58, %v406_v57  ;;  %v405_v0 = vld [vmem:[#allocation2 + $0x720] sm:$0xff] }
  0x93   :  { %1063 = vmatpush1.bf16.msra.mxu1 %v1062_v14  ;;  %v1210_v14 = vpack.c.bf16 %v662_v8, %v660_v6  ;;  %v412_v6 = vld [vmem:[#allocation2 + $0x758] sm:$0xff] }
  0x94   :  { %1191 = vmatpush1.bf16.msra.mxu0 %v1190_v15  ;;  %1065 = vmatprep.subr.bf16.mxu1 %v1064_v17  ;;  %v1084_v15 = vpack.c.bf16 %v392_v10, %v390_v9  ;;  %v389_v17 = vld [vmem:[#allocation2 + $0x6a0] sm:$0xff]  ;;  %v687_v8 = vld [vmem:[#allocation2 + $0xb58] sm:$0xff] }
  0x95   :  { %1193 = vmatprep.subr.bf16.mxu0 %v1192_v23  ;;  %v666_v23 = vld [vmem:[#allocation2 + $0xab0] sm:$0xff]  ;;  %v1086_v28 = vpack.c.bf16 %v391_v20, %v389_v17  ;;  %v414_v20 = vld [vmem:[#allocation2 + $0x768] sm:$0xff] }
  0x96   :  { %498 = vmatmul.mubr.f32.vlgmr.msra.gmra.mrb[2].mxu1 %v866_v13  ;;  %v1082_v13 = vpack.c.bf16 %v387_v5, %v385_v4  ;;  %v682_v4 = vld [vmem:[#allocation2 + $0xb30] sm:$0xff]  ;;  %v410_v5 = vld [vmem:[#allocation2 + $0x748] sm:$0xff] }
  0x97   :  { %1067 = vmatpush1.bf16.msra.mxu1 %v1066_v31  ;;  %773 = vmatmul.mubr.f32.vlgmr.msra.gmra.mrb[2].mxu0 %v575_v30  ;;  %v1088_v30 = vpack.c.bf16 %v396_v25, %v394_v24  ;;  %v393_v31 = vld [vmem:[#allocation2 + $0x6c0] sm:$0xff]  ;;  %v1104_v11 = vpack.c.bf16 %v412_v6, %v410_v5  ;;  %v686_v17 = vld [vmem:[#allocation2 + $0xb50] sm:$0xff] }
  0x98   :  { %1195 = vmatpush1.bf16.msra.mxu0 %v1194_v32  ;;  %1069 = vmatprep.subr.bf16.mxu1 %v1068_v33  ;;  %v395_v32 = vld [vmem:[#allocation2 + $0x6d0] sm:$0xff]  ;;  %v668_v33 = vld [vmem:[#allocation2 + $0xac0] sm:$0xff] }
  0x99   :  { %1197 = vmatprep.subr.bf16.mxu0 %v1196_v37  ;;  %568 = vmatprep.mubr.f32.mxu1 %v869_v29  ;;  %v1214_v29 = vpack.c.bf16 %v666_v23, %v664_v21  ;;  %v400_v37 = vld [vmem:[#allocation2 + $0x6f8] sm:$0xff]  ;;  %v1090_v40 = vpack.c.bf16 %v395_v32, %v393_v31  ;;  %v690_v31 = vld [vmem:[#allocation2 + $0xb70] sm:$0xff]  ;;  %v418_v32 = vld [vmem:[#allocation2 + $0x788] sm:$0xff] }
  0x9a   :  { %843 = vmatprep.mubr.f32.mxu0 %v578_v41  ;;  %v1218_v41 = vpack.c.bf16 %v670_v35, %v668_v33  ;;  %v1092_v42 = vpack.c.bf16 %v400_v37, %v398_v36  ;;  %v416_v21 = vld [vmem:[#allocation2 + $0x778] sm:$0xff] }
  0x9b   :  { %1071 = vmatpush1.bf16.msra.mxu1 %v1070_v18  ;;  %v399_v18 = vld [vmem:[#allocation2 + $0x6f0] sm:$0xff]  ;;  %v691_v23 = vld [vmem:[#allocation2 + $0xb78] sm:$0xff]  ;;  %v1108_v26 = vpack.c.bf16 %v416_v21, %v414_v20 }
  0x9c   :  { %1199 = vmatpush1.bf16.msra.mxu0 %v1198_v16  ;;  %1073 = vmatprep.subr.bf16.mxu1 %v1072_v44  ;;  %v672_v16 = vld [vmem:[#allocation2 + $0xae0] sm:$0xff]  ;;  %v1220_v44 = vpack.c.bf16 %v675_v39, %v673_v38  ;;  %v1094_v50 = vpack.c.bf16 %v399_v18, %v397_v43  ;;  %v420_v33 = vld [vmem:[#allocation2 + $0x798] sm:$0xff]  ;;  %v694_v43 = vld [vmem:[#allocation2 + $0xb90] sm:$0xff] }
  0x9d   :  { %1201 = vmatprep.subr.bf16.mxu0 %v1200_v48  ;;  %v677_v48 = vld [vmem:[#allocation2 + $0xb08] sm:$0xff]  ;;  %v1222_v51 = vpack.c.bf16 %v674_v45, %v672_v16  ;;  %v695_v35 = vld [vmem:[#allocation2 + $0xb98] sm:$0xff]  ;;  %v1112_v38 = vpack.c.bf16 %v420_v33, %v418_v32  ;;  %v417_v39 = vld [vmem:[#allocation2 + $0x780] sm:$0xff] }
  0x9e   :  { %v422_v18 = vld [vmem:[#allocation2 + $0x7a8] sm:$0xff]  ;;  %v424_v16 = vld [vmem:[#allocation2 + $0x7b8] sm:$0xff] }
  0x9f   :  { %1075 = vmatpush1.bf16.msra.mxu1 %v1074_v53  ;;  %v403_v53 = vld [vmem:[#allocation2 + $0x710] sm:$0xff]  ;;  %v699_v45 = vld [vmem:[#allocation2 + $0xbb8] sm:$0xff] }
  0xa0   :  { %1203 = vmatpush1.bf16.msra.mxu0 %v1202_v54  ;;  %1077 = vmatprep.subr.bf16.mxu1 %v1076_v55  ;;  %v676_v54 = vld [vmem:[#allocation2 + $0xb00] sm:$0xff]  ;;  %v1224_v55 = vpack.c.bf16 %v679_v49, %v677_v48  ;;  %v1098_v61 = vpack.c.bf16 %v403_v53, %v401_v52  ;;  %v1116_v48 = vpack.c.bf16 %v424_v16, %v422_v18  ;;  %v698_v52 = vld [vmem:[#allocation2 + $0xbb0] sm:$0xff]  ;;  %v426_v53 = vld [vmem:[#allocation2 + $0x7c8] sm:$0xff] }
  0xa1   :  { %1205 = vmatprep.subr.bf16.mxu0 %v1204_v59  ;;  %v681_v59 = vld [vmem:[#allocation2 + $0xb28] sm:$0xff]  ;;  %v1226_v62 = vpack.c.bf16 %v678_v56, %v676_v54  ;;  %v421_v49 = vld [vmem:[#allocation2 + $0x7a0] sm:$0xff]  ;;  %v428_v54 = vld [vmem:[#allocation2 + $0x7d8] sm:$0xff] }
  0xa2   :  { %v703_v56 = vld [vmem:[#allocation2 + $0xbd8] sm:$0xff] }
  0xa3   :  { %1079 = vmatpush1.bf16.msra.mxu1 %v1078_v1  ;;  %v407_v1 = vld [vmem:[#allocation2 + $0x730] sm:$0xff] }
  0xa4   :  { %1207 = vmatpush1.bf16.msra.mxu0 %v1206_v2  ;;  %1081 = vmatprep.subr.bf16.mxu1 %v1080_v3  ;;  %v680_v2 = vld [vmem:[#allocation2 + $0xb20] sm:$0xff]  ;;  %v1228_v3 = vpack.c.bf16 %v683_v60, %v681_v59  ;;  %v1102_v9 = vpack.c.bf16 %v407_v1, %v405_v0  ;;  %v1120_v59 = vpack.c.bf16 %v428_v54, %v426_v53  ;;  %v702_v0 = vld [vmem:[#allocation2 + $0xbd0] sm:$0xff]  ;;  %v430_v1 = vld [vmem:[#allocation2 + $0x7e8] sm:$0xff] }
  0xa5   :  { %1209 = vmatprep.subr.bf16.mxu0 %v1208_v7  ;;  %v685_v7 = vld [vmem:[#allocation2 + $0xb48] sm:$0xff]  ;;  %v1230_v10 = vpack.c.bf16 %v682_v4, %v680_v2  ;;  %v425_v60 = vld [vmem:[#allocation2 + $0x7c0] sm:$0xff]  ;;  %v432_v2 = vld [vmem:[#allocation2 + $0x7f8] sm:$0xff] }
  0xa6   :  { %v707_v4 = vld [vmem:[#allocation2 + $0xbf8] sm:$0xff] }
  0xa7   :  { %1083 = vmatpush1.bf16.msra.mxu1 %v1082_v13  ;;  %v411_v13 = vld [vmem:[#allocation2 + $0x750] sm:$0xff] }
  0xa8   :  { %1211 = vmatpush1.bf16.msra.mxu0 %v1210_v14  ;;  %1085 = vmatprep.subr.bf16.mxu1 %v1084_v15  ;;  %v684_v14 = vld [vmem:[#allocation2 + $0xb40] sm:$0xff]  ;;  %v1232_v15 = vpack.c.bf16 %v687_v8, %v685_v7  ;;  %v1106_v24 = vpack.c.bf16 %v411_v13, %v409_v12  ;;  %v1124_v7 = vpack.c.bf16 %v432_v2, %v430_v1  ;;  %v706_v12 = vld [vmem:[#allocation2 + $0xbf0] sm:$0xff] }
  0xa9   :  { %1213 = vmatprep.subr.bf16.mxu0 %v1212_v22  ;;  %v689_v22 = vld [vmem:[#allocation2 + $0xb68] sm:$0xff]  ;;  %v1234_v25 = vpack.c.bf16 %v686_v17, %v684_v14  ;;  %v429_v8 = vld [vmem:[#allocation2 + $0x7e0] sm:$0xff]  ;;  %v868_v14 = vld [vmem:[%s1371_s0 + $0x30] sm:$0xff] }
  0xaa   :  { %v1265_v17 = vld [vmem:[%s1371_s0 + $0x10] sm:$0xff] }
  0xab   :  { %1087 = vmatpush1.bf16.msra.mxu1 %v1086_v28  ;;  %v415_v28 = vld [vmem:[#allocation2 + $0x770] sm:$0xff]  ;;  %v577_v20 = vadd.f32 %v1265_v17, %v868_v14 }
  0xac   :  { %1215 = vmatpush1.bf16.msra.mxu0 %v1214_v29  ;;  %1089 = vmatprep.subr.bf16.mxu1 %v1088_v30  ;;  %v688_v29 = vld [vmem:[#allocation2 + $0xb60] sm:$0xff]  ;;  %v1236_v30 = vpack.c.bf16 %v691_v23, %v689_v22  ;;  %v1110_v36 = vpack.c.bf16 %v415_v28, %v413_v27 }
  0xad   :  { %1217 = vmatprep.subr.bf16.mxu0 %v1216_v34  ;;  %v693_v34 = vld [vmem:[#allocation2 + $0xb88] sm:$0xff]  ;;  %v1238_v37 = vpack.c.bf16 %v690_v31, %v688_v29 }
  0xaf   :  { %1091 = vmatpush1.bf16.msra.mxu1 %v1090_v40  ;;  %v419_v40 = vld [vmem:[#allocation2 + $0x790] sm:$0xff] }
  0xb0   :  { %1219 = vmatpush1.bf16.msra.mxu0 %v1218_v41  ;;  %1093 = vmatprep.subr.bf16.mxu1 %v1092_v42  ;;  %v692_v41 = vld [vmem:[#allocation2 + $0xb80] sm:$0xff]  ;;  %v1240_v42 = vpack.c.bf16 %v695_v35, %v693_v34  ;;  %v1114_v46 = vpack.c.bf16 %v419_v40, %v417_v39 }
  0xb1   :  { %1221 = vmatprep.subr.bf16.mxu0 %v1220_v44  ;;  %v697_v44 = vld [vmem:[#allocation2 + $0xba8] sm:$0xff]  ;;  %v1242_v47 = vpack.c.bf16 %v694_v43, %v692_v41 }
  0xb3   :  { %1095 = vmatpush1.bf16.msra.mxu1 %v1094_v50  ;;  %v423_v50 = vld [vmem:[#allocation2 + $0x7b0] sm:$0xff] }
  0xb4   :  { %1223 = vmatpush1.bf16.msra.mxu0 %v1222_v51  ;;  %1097 = vmatprep.subr.bf16.mxu1 %v1096_v19  ;;  %v696_v51 = vld [vmem:[#allocation2 + $0xba0] sm:$0xff]  ;;  %v1244_v19 = vpack.c.bf16 %v699_v45, %v697_v44  ;;  %v1118_v57 = vpack.c.bf16 %v423_v50, %v421_v49 }
  0xb5   :  { %1225 = vmatprep.subr.bf16.mxu0 %v1224_v55  ;;  %v701_v55 = vld [vmem:[#allocation2 + $0xbc8] sm:$0xff]  ;;  %v1246_v58 = vpack.c.bf16 %v698_v52, %v696_v51 }
  0xb7   :  { %1099 = vmatpush1.bf16.msra.mxu1 %v1098_v61  ;;  %v427_v61 = vld [vmem:[#allocation2 + $0x7d0] sm:$0xff] }
  0xb8   :  { %1227 = vmatpush1.bf16.msra.mxu0 %v1226_v62  ;;  %1101 = vmatprep.subr.bf16.mxu1 %v1100_v63  ;;  %v700_v62 = vld [vmem:[#allocation2 + $0xbc0] sm:$0xff]  ;;  %v1248_v63 = vpack.c.bf16 %v703_v56, %v701_v55  ;;  %v1122_v5 = vpack.c.bf16 %v427_v61, %v425_v60 }
  0xb9   :  { %1229 = vmatprep.subr.bf16.mxu0 %v1228_v3  ;;  %v705_v3 = vld [vmem:[#allocation2 + $0xbe8] sm:$0xff]  ;;  %v1250_v6 = vpack.c.bf16 %v702_v0, %v700_v62 }
  0xbb   :  { %1103 = vmatpush1.bf16.msra.mxu1 %v1102_v9  ;;  %v431_v9 = vld [vmem:[#allocation2 + $0x7f0] sm:$0xff] }
  0xbc   :  { %1231 = vmatpush1.bf16.msra.mxu0 %v1230_v10  ;;  %1105 = vmatprep.subr.bf16.mxu1 %v1104_v11  ;;  %v1252_v10 = vpack.c.bf16 %v707_v4, %v705_v3  ;;  %v704_v11 = vld [vmem:[#allocation2 + $0xbe0] sm:$0xff]  ;;  %v1126_v13 = vpack.c.bf16 %v431_v9, %v429_v8 }
  0xbd   :  { %1233 = vmatprep.subr.bf16.mxu0 %v1232_v15  ;;  %v1254_v15 = vpack.c.bf16 %v706_v12, %v704_v11 }
  0xbf   :  { %1107 = vmatpush1.bf16.msra.mxu1 %v1106_v24 }
  0xc0   :  { %1235 = vmatpush1.bf16.msra.mxu0 %v1234_v25  ;;  %1109 = vmatprep.subr.bf16.mxu1 %v1108_v26 }
  0xc1   :  { %1237 = vmatprep.subr.bf16.mxu0 %v1236_v30 }
  0xc3   :  { %1111 = vmatpush1.bf16.msra.mxu1 %v1110_v36 }
  0xc4   :  { %1239 = vmatpush1.bf16.msra.mxu0 %v1238_v37  ;;  %1113 = vmatprep.subr.bf16.mxu1 %v1112_v38 }
  0xc5   :  { %1241 = vmatprep.subr.bf16.mxu0 %v1240_v42 }
  0xc7   :  { %1115 = vmatpush1.bf16.msra.mxu1 %v1114_v46 }
  0xc8   :  { %1243 = vmatpush1.bf16.msra.mxu0 %v1242_v47  ;;  %1117 = vmatprep.subr.bf16.mxu1 %v1116_v48 }
  0xc9   :  { %1245 = vmatprep.subr.bf16.mxu0 %v1244_v19 }
  0xcb   :  { %1119 = vmatpush1.bf16.msra.mxu1 %v1118_v57 }
  0xcc   :  { %1247 = vmatpush1.bf16.msra.mxu0 %v1246_v58  ;;  %1121 = vmatprep.subr.bf16.mxu1 %v1120_v59 }
  0xcd   :  { %1249 = vmatprep.subr.bf16.mxu0 %v1248_v63 }
  0xcf   :  { %1123 = vmatpush1.bf16.msra.mxu1 %v1122_v5 }
  0xd0   :  { %1251 = vmatpush1.bf16.msra.mxu0 %v1250_v6  ;;  %1125 = vmatprep.subr.bf16.mxu1 %v1124_v7 }
  0xd1   :  { %1253 = vmatprep.subr.bf16.mxu0 %v1252_v10 }
  0xd3   :  { %1127 = vmatpush1.bf16.msra.mxu1 %v1126_v13 }
  0xd4   :  { %1255 = vmatpush1.bf16.msra.mxu0 %v1254_v15 }
  0xd6   :  { %569 = vmatmul.mubr.f32.vlgmr.msra.gmra.mrb[2].mxu1 %v868_v14 }
  0xd7   :  { %844 = vmatmul.mubr.f32.vlgmr.msra.gmra.mrb[2].mxu0 %v577_v20 }
 0x129   :  { %v228_v21 = vpop.f32.mrb[0].mxu1 }
 0x12a   :  { %v299_v22 = vpop.f32.mrb[0].mxu0  ;;  %v230_v23 = vpop.f32.mrb[1].mxu1 }
 0x12b   :  { %v300_v24 = vadd.f32 %v299_v22, %v228_v21  ;;  %v301_v25 = vpop.f32.mrb[1].mxu0 }
 0x12c   :  { %v302_v26 = vadd.f32 %v301_v25, %v230_v23 }
 0x1a9   :  { %v570_v27 = vpop.f32.mrb[2].mxu1 }
 0x1aa   :  { %v850_v28 = vsub.f32 %v300_v24, %v570_v27  ;;  %v845_v29 = vpop.f32.mrb[2].mxu0  ;;  %v572_v30 = vpop.f32.mrb[3].mxu1 }
 0x1ab   :  { %v854_v31 = vsub.f32 %v845_v29, %v300_v24  ;;  %v851_v32 = vsub.f32 %v302_v26, %v572_v30  ;;  %v847_v33 = vpop.f32.mrb[3].mxu0 }
 0x1ac   :  { %852 = vst [vmem:[%s1373_s2] sm:$0xff] %v850_v28  ;;  %v855_v34 = vsub.f32 %v847_v33, %v302_v26 }
 0x1ad   :  { %v856_v35 = vsub.f32 %v854_v31, %v570_v27  ;;  %853 = vst [vmem:[%s1373_s2 + $0x8] sm:$0xff] %v851_v32 }
 0x1ae   :  { %v857_v36 = vsub.f32 %v855_v34, %v572_v30 }
 0x1af   :  { %870 = vst [vmem:[%s1373_s2 + $0x10] sm:$0xff] %v856_v35 }
 0x1b0   :  { %871 = vst [vmem:[%s1373_s2 + $0x18] sm:$0xff] %v857_v36 }
 0x1b1   :  { %865 = vsyncpa [#allocation3], 1 }

</bundles_post_ra>
